<compile_context>
chip_gen: v5e
topology: v5e:2x2
jax: 0.10.0
libtpu: 0.0.40
codegen_flags: <defaults>
</compile_context>

<pallas_src>
import jax
import jax.numpy as jnp
import numpy as np
from jax.experimental import pallas as pl
from jax.experimental.pallas import tpu as pltpu

LATENT = 32
BN_EPS = 1e-5
K = 3
STRIDE = 2

_VMEM = pl.BlockSpec(memory_space=pltpu.MemorySpace.VMEM)


# --------------------------- single fused kernel ---------------------------

def decoder_kernel(x_ref, w1_ref, bl1_ref, w2s_ref, bl2s_ref,
                   rg1_ref, wb1_ref, ind1_ref, g1_ref, be1_ref,
                   rg2_ref, wb2_ref, ind2_ref, g2_ref, be2_ref,
                   rg3_ref, wb3_ref, cb3_ref, out_ref):

    def dot(a, b):
        return jnp.dot(a, b, preferred_element_type=jnp.float32)

    def convt(a, rg_ref, wb_ref):
        # ConvTranspose2d, gather-after-matmul with fused kh taps:
        #   P = a @ [B_0|B_1|B_2]   (a: [rows_in, Win*Cin], P: [rows_in, K*OW*Cout])
        #   Y = sum_kh R_kh @ P[:, kh*OW*Cout : (kh+1)*OW*Cout]
        p = dot(a, wb_ref[...])
        lw = p.shape[1] // K
        acc = dot(rg_ref[0], p[:, :lw])
        acc = acc + dot(rg_ref[1], p[:, lw:2 * lw])
        acc = acc + dot(rg_ref[2], p[:, 2 * lw:])
        return acc

    def bn_relu(z, ind_ref, g_ref, be_ref):
        # training-mode BatchNorm (biased var), single pass, then ReLU.
        ind = ind_ref[...]                                   # [OW*C, C]
        C = ind.shape[1]
        OW = ind.shape[0] // C
        inv_cnt = 1.0 / float(z.shape[0] * OW)
        sums = jnp.concatenate(
            [jnp.sum(z, axis=0, keepdims=True),
             jnp.sum(z * z, axis=0, keepdims=True)], axis=0)            # [2, OW*C]
        stats = dot(sums, ind) * inv_cnt                                 # [2, C]
        mean = stats[0:1, :]
        var = jnp.maximum(stats[1:2, :] - mean * mean, 0.0)             # clamp cancellation
        scale = g_ref[...] * jax.lax.rsqrt(var + BN_EPS)                 # [1, C]
        shift = be_ref[...] - mean * scale
        scale_l = jnp.tile(scale, (1, OW))                               # lane (ow, c)
        shift_l = jnp.tile(shift, (1, OW))
        return jnp.maximum(z * scale_l + shift_l, 0.0)

    # ---- MLP: Linear(32,96)+ReLU; Linear(96,288)+ReLU emitted as 3 h-chunks ----
    h1 = jnp.maximum(dot(x_ref[...], w1_ref[...]) + bl1_ref[...], 0.0)   # [N, 96]
    c0 = dot(h1, w2s_ref[0]) + bl2s_ref[0]                               # [N, 96] (h=0)
    c1 = dot(h1, w2s_ref[1]) + bl2s_ref[1]                               # [N, 96] (h=1)
    c2 = dot(h1, w2s_ref[2]) + bl2s_ref[2]                               # [N, 96] (h=2)
    # Unflatten(32,3,3) -> conv layout [(h,n) rows, (w,cin) lanes] via row concat
    a = jnp.maximum(jnp.concatenate([c0, c1, c2], axis=0), 0.0)          # [3N, 96]

    # conv biases for layers 1 & 2 are dropped (cancelled by BN mean subtraction)
    a = bn_relu(convt(a, rg1_ref, wb1_ref), ind1_ref, g1_ref, be1_ref)   # [N*7, 7*16]
    a = bn_relu(convt(a, rg2_ref, wb2_ref), ind2_ref, g2_ref, be2_ref)   # [N*15, 15*8]
    a = convt(a, rg3_ref, wb3_ref) + cb3_ref[...]                        # [N*28, 28]
    out_ref[...] = 0.5 * jnp.tanh(0.5 * a) + 0.5                         # sigmoid on EUP


# ------------------- one-time host-side constant / weight prep -------------------

def _row_gather(N, Hin, OH, pad_lo, h_major=False):
    """R[kh, (n,oh), in_row] = 1  iff  oh + kh == pad_lo + STRIDE*h (H dilation+pad+tap)."""
    R = np.zeros((K, N * OH, N * Hin), np.float32)
    for kh in range(K):
        for oh in range(OH):
            num = oh + kh - pad_lo
            if num < 0 or num % STRIDE:
                continue
            h = num // STRIDE
            if h >= Hin:
                continue
            for n in range(N):
                R[kh, n * OH + oh, (h * N + n) if h_major else (n * Hin + h)] = 1.0
    return R


def _lane_tap_mask(Win, OW, pad_lo):
    """T[w, ow, kw] = 1  iff  pad_lo + STRIDE*w == ow + kw (W dilation+pad+tap)."""
    T = np.zeros((Win, OW, K), np.float32)
    for w in range(Win):
        for ow in range(OW):
            kw = pad_lo + STRIDE * w - ow
            if 0 <= kw < K:
                T[w, ow, kw] = 1.0
    return T


def _channel_indicator(OW, C):
    ind = np.zeros((OW * C, C), np.float32)
    for ow in range(OW):
        ind[ow * C:(ow + 1) * C] = np.eye(C, dtype=np.float32)
    return ind


def _lane_conv_matrix(wt, T):
    """B[kh, (w,cin), (ow,cout)]: folds kw taps, W dilation/padding and Cin contraction."""
    Cin, Cout = wt.shape[0], wt.shape[1]
    Win, OW = T.shape[0], T.shape[1]
    wflip = jnp.flip(wt, axis=(2, 3))                      # correlation form [Cin,Cout,kh,kw]
    B = jnp.einsum('wok,dchk->hwdoc', jnp.asarray(T), wflip)
    return B.reshape(K, Win * Cin, OW * Cout)


def prepare_params(params, batch):
    """One-time weight re-layout (analogous to module construction); done outside the hot path."""
    N = batch
    prep = {"w1": params["w1"], "bl1": params["b1"].reshape(1, 96)}

    # Linear(96,288): permute output features (c,h,w) -> (h,w,c) and split by h so the
    # kernel emits the Unflatten result directly in the conv layout (no transpose later).
    perm = np.array([c * 9 + h * 3 + w
                     for h in range(3) for w in range(3) for c in range(32)], np.int32)
    w2p = params["w2"][:, perm]                                                # [96, 288]
    b2p = params["b2"][perm]
    prep["w2s"] = jnp.stack([w2p[:, 96 * h:96 * (h + 1)] for h in range(3)])   # [3, 96, 96]
    prep["bl2s"] = b2p.reshape(3, 96)[:, None, :]                              # [3, 1, 96]

    convs = [  # (idx, Hin, Cout, pad, out_pad, h_major, wt, bias, gamma, beta)
        (1, 3, 16, 0, 0, True,  params["wt1"], params["bc1"], params["g1"], params["be1"]),
        (2, 7, 8,  0, 0, False, params["wt2"], params["bc2"], params["g2"], params["be2"]),
        (3, 15, 1, 2, 1, False, params["wt3"], params["bc3"], None, None),
    ]
    for (i, Hin, Cout, pad, op, h_major, wt, b, g, be) in convs:
        OH = (Hin - 1) * STRIDE - 2 * pad + K + op       # square: OW == OH, Win == Hin
        pad_lo = K - 1 - pad
        prep[f"rg{i}"] = jnp.asarray(_row_gather(N, Hin, OH, pad_lo, h_major))
        B = _lane_conv_matrix(wt, _lane_tap_mask(Hin, OH, pad_lo))   # [K, Win*Cin, OW*Cout]
        prep[f"wb{i}"] = jnp.concatenate([B[k] for k in range(K)], axis=1)  # B_cat, fused kh
        if g is not None:
            prep[f"ind{i}"] = jnp.asarray(_channel_indicator(OH, Cout))
            prep[f"g{i}"] = g.reshape(1, Cout)
            prep[f"be{i}"] = be.reshape(1, Cout)
        else:
            # conv bias kept only where no BN follows (BN cancels per-channel constants)
            prep[f"cb{i}"] = jnp.tile(b, OH).reshape(1, OH * Cout)
    return prep


@jax.jit
def decoder_forward(x, prep):
    N = x.shape[0]
    # prep constants are baked for a fixed batch size; fail loudly if it differs.
    assert prep["rg3"].shape[1] == N * 28, "prepare_params was built for a different batch size"
    out = pl.pallas_call(
        decoder_kernel,
        out_shape=jax.ShapeDtypeStruct((N * 28, 28), jnp.float32),
        in_specs=[_VMEM] * 18,
        out_specs=_VMEM,
    )(x, prep["w1"], prep["bl1"], prep["w2s"], prep["bl2s"],
      prep["rg1"], prep["wb1"], prep["ind1"], prep["g1"], prep["be1"],
      prep["rg2"], prep["wb2"], prep["ind2"], prep["g2"], prep["be2"],
      prep["rg3"], prep["wb3"], prep["cb3"])
    return out.reshape(N, 1, 28, 28)     # rows are (n, oh) n-major, lanes are ow


# ----------------------- pure-JAX reference (self-check) -----------------------

def reference_forward(x, p):
    h = jnp.maximum(x @ p["w1"] + p["b1"], 0.0)
    h = jnp.maximum(h @ p["w2"] + p["b2"], 0.0)
    h = h.reshape(x.shape[0], 32, 3, 3)

    def convt(z, wt, b, stride, pad, out_pad):
        k = wt.shape[2]
        w = jnp.flip(wt, axis=(2, 3))
        lo, hi = k - 1 - pad, k - 1 - pad + out_pad
        y = jax.lax.conv_general_dilated(
            z, w, window_strides=(1, 1), padding=((lo, hi), (lo, hi)),
            lhs_dilation=(stride, stride),
            dimension_numbers=("NCHW", "IOHW", "NCHW"))
        return y + b.reshape(1, -1, 1, 1)

    def bn(z, g, be):
        m = z.mean(axis=(0, 2, 3), keepdims=True)
        v = jnp.square(z - m).mean(axis=(0, 2, 3), keepdims=True)
        return (z - m) * jax.lax.rsqrt(v + BN_EPS) * g.reshape(1, -1, 1, 1) + be.reshape(1, -1, 1, 1)

    h = jnp.maximum(bn(convt(h, p["wt1"], p["bc1"], 2, 0, 0), p["g1"], p["be1"]), 0.0)
    h = jnp.maximum(bn(convt(h, p["wt2"], p["bc2"], 2, 0, 0), p["g2"], p["be2"]), 0.0)
    h = convt(h, p["wt3"], p["bc3"], 2, 2, 1)
    return jax.nn.sigmoid(h)


# ----------------------- deterministic parameter init -----------------------

def init_params(key):
    ks = jax.random.split(key, 10)

    def u(k, shape, fan_in):
        bound = 1.0 / float(np.sqrt(fan_in))
        return jax.random.uniform(k, shape, jnp.float32, -bound, bound)

    return dict(
        w1=u(ks[0], (LATENT, 96), LATENT),        b1=u(ks[1], (96,), LATENT),
        w2=u(ks[2], (96, 32 * 3 * 3), 96),        b2=u(ks[3], (32 * 3 * 3,), 96),
        wt1=u(ks[4], (32, 16, 3, 3), 32 * 9),     bc1=u(ks[5], (16,), 32 * 9),
        g1=jnp.ones((16,), jnp.float32),          be1=jnp.zeros((16,), jnp.float32),
        wt2=u(ks[6], (16, 8, 3, 3), 16 * 9),      bc2=u(ks[7], (8,), 16 * 9),
        g2=jnp.ones((8,), jnp.float32),           be2=jnp.zeros((8,), jnp.float32),
        wt3=u(ks[8], (8, 1, 3, 3), 8 * 9),        bc3=u(ks[9], (1,), 8 * 9),
    )


if __name__ == "__main__":
    key = jax.random.PRNGKey(0)
    pkey, xkey = jax.random.split(key)
    params = init_params(pkey)
    x = jax.random.normal(xkey, (2, LATENT), jnp.float32)   # batch=2, latent=32

    prep = prepare_params(params, batch=x.shape[0])
    out = decoder_forward(x, prep)
    out = jax.block_until_ready(out)
    assert out.shape == (2, 1, 28, 28), out.shape

    ref = reference_forward(x, params)
    # Exact-f32 data path + tanh-form sigmoid: tolerance tightened 10x vs. prior version.
    np.testing.assert_allclose(np.asarray(out), np.asarray(ref), atol=1e-3, rtol=1e-3)
    print("KERNEL_OK")
</pallas_src>

<mosaic_0001>
module attributes {stable_mosaic.version = 11 : i64} {
  func.func @decoder_kernel(%arg0: memref<2x32xf32, #tpu.memory_space<vmem>>, %arg1: memref<32x96xf32, #tpu.memory_space<vmem>>, %arg2: memref<1x96xf32, #tpu.memory_space<vmem>>, %arg3: memref<3x96x96xf32, #tpu.memory_space<vmem>>, %arg4: memref<3x1x96xf32, #tpu.memory_space<vmem>>, %arg5: memref<3x14x6xf32, #tpu.memory_space<vmem>>, %arg6: memref<96x336xf32, #tpu.memory_space<vmem>>, %arg7: memref<112x16xf32, #tpu.memory_space<vmem>>, %arg8: memref<1x16xf32, #tpu.memory_space<vmem>>, %arg9: memref<1x16xf32, #tpu.memory_space<vmem>>, %arg10: memref<3x30x14xf32, #tpu.memory_space<vmem>>, %arg11: memref<112x360xf32, #tpu.memory_space<vmem>>, %arg12: memref<120x8xf32, #tpu.memory_space<vmem>>, %arg13: memref<1x8xf32, #tpu.memory_space<vmem>>, %arg14: memref<1x8xf32, #tpu.memory_space<vmem>>, %arg15: memref<3x56x30xf32, #tpu.memory_space<vmem>>, %arg16: memref<120x84xf32, #tpu.memory_space<vmem>>, %arg17: memref<1x28xf32, #tpu.memory_space<vmem>>, %arg18: memref<56x28xf32, #tpu.memory_space<vmem>>) attributes {dimension_semantics = [], scalar_prefetch = 0 : i64, scratch_operands = 0 : i64, tpu.core_type = #tpu.core_type<tc>} {
    %c0 = arith.constant 0 : index
    %c0_0 = arith.constant 0 : index
    %0 = vector.load %arg0[%c0, %c0_0] : memref<2x32xf32, #tpu.memory_space<vmem>>, vector<2x32xf32>
    %c0_1 = arith.constant 0 : index
    %c0_2 = arith.constant 0 : index
    %1 = vector.load %arg1[%c0_1, %c0_2] : memref<32x96xf32, #tpu.memory_space<vmem>>, vector<32x96xf32>
    %cst = arith.constant dense<0.000000e+00> : vector<2x96xf32>
    %2 = tpu.matmul %0, %1, %cst {dimension_numbers = #tpu.dot_dimension_numbers<[1], [0], [0], [1], [0, 0, 1, 1], [], []>} : vector<2x32xf32>, vector<32x96xf32>, vector<2x96xf32> -> vector<2x96xf32>
    %c0_3 = arith.constant 0 : index
    %c0_4 = arith.constant 0 : index
    %3 = vector.load %arg2[%c0_3, %c0_4] : memref<1x96xf32, #tpu.memory_space<vmem>>, vector<1x96xf32>
    %4 = vector.broadcast %3 : vector<1x96xf32> to vector<2x96xf32>
    %5 = arith.addf %2, %4 : vector<2x96xf32>
    %cst_5 = arith.constant 0.000000e+00 : f32
    %6 = vector.broadcast %cst_5 : f32 to vector<2x96xf32>
    %7 = arith.maximumf %5, %6 : vector<2x96xf32>
    %c0_6 = arith.constant 0 : index
    %c0_7 = arith.constant 0 : index
    %c0_8 = arith.constant 0 : index
    %8 = vector.load %arg3[%c0_6, %c0_7, %c0_8] : memref<3x96x96xf32, #tpu.memory_space<vmem>>, vector<1x96x96xf32>
    %9 = vector.shape_cast %8 : vector<1x96x96xf32> to vector<96x96xf32>
    %cst_9 = arith.constant dense<0.000000e+00> : vector<2x96xf32>
    %10 = tpu.matmul %7, %9, %cst_9 {dimension_numbers = #tpu.dot_dimension_numbers<[1], [0], [0], [1], [0, 0, 1, 1], [], []>} : vector<2x96xf32>, vector<96x96xf32>, vector<2x96xf32> -> vector<2x96xf32>
    %c0_10 = arith.constant 0 : index
    %c0_11 = arith.constant 0 : index
    %c0_12 = arith.constant 0 : index
    %11 = vector.load %arg4[%c0_10, %c0_11, %c0_12] : memref<3x1x96xf32, #tpu.memory_space<vmem>>, vector<1x1x96xf32>
    %12 = vector.shape_cast %11 : vector<1x1x96xf32> to vector<1x96xf32>
    %13 = vector.broadcast %12 : vector<1x96xf32> to vector<2x96xf32>
    %14 = arith.addf %10, %13 : vector<2x96xf32>
    %c1 = arith.constant 1 : index
    %c0_13 = arith.constant 0 : index
    %c0_14 = arith.constant 0 : index
    %15 = vector.load %arg3[%c1, %c0_13, %c0_14] : memref<3x96x96xf32, #tpu.memory_space<vmem>>, vector<1x96x96xf32>
    %16 = vector.shape_cast %15 : vector<1x96x96xf32> to vector<96x96xf32>
    %cst_15 = arith.constant dense<0.000000e+00> : vector<2x96xf32>
    %17 = tpu.matmul %7, %16, %cst_15 {dimension_numbers = #tpu.dot_dimension_numbers<[1], [0], [0], [1], [0, 0, 1, 1], [], []>} : vector<2x96xf32>, vector<96x96xf32>, vector<2x96xf32> -> vector<2x96xf32>
    %c1_16 = arith.constant 1 : index
    %c0_17 = arith.constant 0 : index
    %c0_18 = arith.constant 0 : index
    %18 = vector.load %arg4[%c1_16, %c0_17, %c0_18] : memref<3x1x96xf32, #tpu.memory_space<vmem>>, vector<1x1x96xf32>
    %19 = vector.shape_cast %18 : vector<1x1x96xf32> to vector<1x96xf32>
    %20 = vector.broadcast %19 : vector<1x96xf32> to vector<2x96xf32>
    %21 = arith.addf %17, %20 : vector<2x96xf32>
    %c2 = arith.constant 2 : index
    %c0_19 = arith.constant 0 : index
    %c0_20 = arith.constant 0 : index
    %22 = vector.load %arg3[%c2, %c0_19, %c0_20] : memref<3x96x96xf32, #tpu.memory_space<vmem>>, vector<1x96x96xf32>
    %23 = vector.shape_cast %22 : vector<1x96x96xf32> to vector<96x96xf32>
    %cst_21 = arith.constant dense<0.000000e+00> : vector<2x96xf32>
    %24 = tpu.matmul %7, %23, %cst_21 {dimension_numbers = #tpu.dot_dimension_numbers<[1], [0], [0], [1], [0, 0, 1, 1], [], []>} : vector<2x96xf32>, vector<96x96xf32>, vector<2x96xf32> -> vector<2x96xf32>
    %c2_22 = arith.constant 2 : index
    %c0_23 = arith.constant 0 : index
    %c0_24 = arith.constant 0 : index
    %25 = vector.load %arg4[%c2_22, %c0_23, %c0_24] : memref<3x1x96xf32, #tpu.memory_space<vmem>>, vector<1x1x96xf32>
    %26 = vector.shape_cast %25 : vector<1x1x96xf32> to vector<1x96xf32>
    %27 = vector.broadcast %26 : vector<1x96xf32> to vector<2x96xf32>
    %28 = arith.addf %24, %27 : vector<2x96xf32>
    %29 = tpu.concatenate %14, %21, %28 in 0 : vector<2x96xf32>, vector<2x96xf32>, vector<2x96xf32> -> vector<6x96xf32>
    %cst_25 = arith.constant 0.000000e+00 : f32
    %30 = vector.broadcast %cst_25 : f32 to vector<6x96xf32>
    %31 = arith.maximumf %29, %30 : vector<6x96xf32>
    %c0_26 = arith.constant 0 : index
    %c0_27 = arith.constant 0 : index
    %32 = vector.load %arg6[%c0_26, %c0_27] : memref<96x336xf32, #tpu.memory_space<vmem>>, vector<96x336xf32>
    %cst_28 = arith.constant dense<0.000000e+00> : vector<6x336xf32>
    %33 = tpu.matmul %31, %32, %cst_28 {dimension_numbers = #tpu.dot_dimension_numbers<[1], [0], [0], [1], [0, 0, 1, 1], [], []>} : vector<6x96xf32>, vector<96x336xf32>, vector<6x336xf32> -> vector<6x336xf32>
    %c0_29 = arith.constant 0 : index
    %c0_30 = arith.constant 0 : index
    %c0_31 = arith.constant 0 : index
    %34 = vector.load %arg5[%c0_29, %c0_30, %c0_31] : memref<3x14x6xf32, #tpu.memory_space<vmem>>, vector<1x14x6xf32>
    %35 = vector.shape_cast %34 : vector<1x14x6xf32> to vector<14x6xf32>
    %36 = vector.extract_strided_slice %33 {offsets = [0, 0], sizes = [6, 112], strides = [1, 1]} : vector<6x336xf32> to vector<6x112xf32>
    %cst_32 = arith.constant dense<0.000000e+00> : vector<14x112xf32>
    %37 = tpu.matmul %35, %36, %cst_32 {dimension_numbers = #tpu.dot_dimension_numbers<[1], [0], [0], [1], [0, 0, 1, 1], [], []>} : vector<14x6xf32>, vector<6x112xf32>, vector<14x112xf32> -> vector<14x112xf32>
    %c1_33 = arith.constant 1 : index
    %c0_34 = arith.constant 0 : index
    %c0_35 = arith.constant 0 : index
    %38 = vector.load %arg5[%c1_33, %c0_34, %c0_35] : memref<3x14x6xf32, #tpu.memory_space<vmem>>, vector<1x14x6xf32>
    %39 = vector.shape_cast %38 : vector<1x14x6xf32> to vector<14x6xf32>
    %40 = vector.extract_strided_slice %33 {offsets = [0, 112], sizes = [6, 112], strides = [1, 1]} : vector<6x336xf32> to vector<6x112xf32>
    %cst_36 = arith.constant dense<0.000000e+00> : vector<14x112xf32>
    %41 = tpu.matmul %39, %40, %cst_36 {dimension_numbers = #tpu.dot_dimension_numbers<[1], [0], [0], [1], [0, 0, 1, 1], [], []>} : vector<14x6xf32>, vector<6x112xf32>, vector<14x112xf32> -> vector<14x112xf32>
    %42 = arith.addf %37, %41 : vector<14x112xf32>
    %c2_37 = arith.constant 2 : index
    %c0_38 = arith.constant 0 : index
    %c0_39 = arith.constant 0 : index
    %43 = vector.load %arg5[%c2_37, %c0_38, %c0_39] : memref<3x14x6xf32, #tpu.memory_space<vmem>>, vector<1x14x6xf32>
    %44 = vector.shape_cast %43 : vector<1x14x6xf32> to vector<14x6xf32>
    %45 = vector.extract_strided_slice %33 {offsets = [0, 224], sizes = [6, 112], strides = [1, 1]} : vector<6x336xf32> to vector<6x112xf32>
    %cst_40 = arith.constant dense<0.000000e+00> : vector<14x112xf32>
    %46 = tpu.matmul %44, %45, %cst_40 {dimension_numbers = #tpu.dot_dimension_numbers<[1], [0], [0], [1], [0, 0, 1, 1], [], []>} : vector<14x6xf32>, vector<6x112xf32>, vector<14x112xf32> -> vector<14x112xf32>
    %47 = arith.addf %42, %46 : vector<14x112xf32>
    %c0_41 = arith.constant 0 : index
    %c0_42 = arith.constant 0 : index
    %48 = vector.load %arg7[%c0_41, %c0_42] : memref<112x16xf32, #tpu.memory_space<vmem>>, vector<112x16xf32>
    %cst_43 = arith.constant dense<0.000000e+00> : vector<112xf32>
    %49 = vector.multi_reduction <add>, %47, %cst_43 [0] : vector<14x112xf32> to vector<112xf32>
    %50 = vector.shape_cast %49 : vector<112xf32> to vector<1x112xf32>
    %51 = arith.mulf %47, %47 : vector<14x112xf32>
    %cst_44 = arith.constant dense<0.000000e+00> : vector<112xf32>
    %52 = vector.multi_reduction <add>, %51, %cst_44 [0] : vector<14x112xf32> to vector<112xf32>
    %53 = vector.shape_cast %52 : vector<112xf32> to vector<1x112xf32>
    %54 = tpu.concatenate %50, %53 in 0 : vector<1x112xf32>, vector<1x112xf32> -> vector<2x112xf32>
    %cst_45 = arith.constant dense<0.000000e+00> : vector<2x16xf32>
    %55 = tpu.matmul %54, %48, %cst_45 {dimension_numbers = #tpu.dot_dimension_numbers<[1], [0], [0], [1], [0, 0, 1, 1], [], []>} : vector<2x112xf32>, vector<112x16xf32>, vector<2x16xf32> -> vector<2x16xf32>
    %cst_46 = arith.constant 0.0102040814 : f32
    %56 = vector.broadcast %cst_46 : f32 to vector<2x16xf32>
    %57 = arith.mulf %55, %56 : vector<2x16xf32>
    %58 = vector.extract_strided_slice %57 {offsets = [0, 0], sizes = [1, 16], strides = [1, 1]} : vector<2x16xf32> to vector<1x16xf32>
    %59 = vector.extract_strided_slice %57 {offsets = [1, 0], sizes = [1, 16], strides = [1, 1]} : vector<2x16xf32> to vector<1x16xf32>
    %60 = arith.mulf %58, %58 : vector<1x16xf32>
    %61 = arith.subf %59, %60 : vector<1x16xf32>
    %cst_47 = arith.constant 0.000000e+00 : f32
    %62 = vector.broadcast %cst_47 : f32 to vector<1x16xf32>
    %63 = arith.maximumf %61, %62 : vector<1x16xf32>
    %c0_48 = arith.constant 0 : index
    %c0_49 = arith.constant 0 : index
    %64 = vector.load %arg8[%c0_48, %c0_49] : memref<1x16xf32, #tpu.memory_space<vmem>>, vector<1x16xf32>
    %cst_50 = arith.constant 9.99999974E-6 : f32
    %65 = vector.broadcast %cst_50 : f32 to vector<1x16xf32>
    %66 = arith.addf %63, %65 : vector<1x16xf32>
    %67 = math.rsqrt %66 : vector<1x16xf32>
    %68 = arith.mulf %64, %67 : vector<1x16xf32>
    %c0_51 = arith.constant 0 : index
    %c0_52 = arith.constant 0 : index
    %69 = vector.load %arg9[%c0_51, %c0_52] : memref<1x16xf32, #tpu.memory_space<vmem>>, vector<1x16xf32>
    %70 = arith.mulf %58, %68 : vector<1x16xf32>
    %71 = arith.subf %69, %70 : vector<1x16xf32>
    %72 = tpu.concatenate %68, %68, %68, %68, %68, %68, %68 in 1 : vector<1x16xf32>, vector<1x16xf32>, vector<1x16xf32>, vector<1x16xf32>, vector<1x16xf32>, vector<1x16xf32>, vector<1x16xf32> -> vector<1x112xf32>
    %73 = tpu.concatenate %71, %71, %71, %71, %71, %71, %71 in 1 : vector<1x16xf32>, vector<1x16xf32>, vector<1x16xf32>, vector<1x16xf32>, vector<1x16xf32>, vector<1x16xf32>, vector<1x16xf32> -> vector<1x112xf32>
    %74 = vector.broadcast %72 : vector<1x112xf32> to vector<14x112xf32>
    %75 = arith.mulf %47, %74 : vector<14x112xf32>
    %76 = vector.broadcast %73 : vector<1x112xf32> to vector<14x112xf32>
    %77 = arith.addf %75, %76 : vector<14x112xf32>
    %cst_53 = arith.constant 0.000000e+00 : f32
    %78 = vector.broadcast %cst_53 : f32 to vector<14x112xf32>
    %79 = arith.maximumf %77, %78 : vector<14x112xf32>
    %c0_54 = arith.constant 0 : index
    %c0_55 = arith.constant 0 : index
    %80 = vector.load %arg11[%c0_54, %c0_55] : memref<112x360xf32, #tpu.memory_space<vmem>>, vector<112x360xf32>
    %cst_56 = arith.constant dense<0.000000e+00> : vector<14x360xf32>
    %81 = tpu.matmul %79, %80, %cst_56 {dimension_numbers = #tpu.dot_dimension_numbers<[1], [0], [0], [1], [0, 0, 1, 1], [], []>} : vector<14x112xf32>, vector<112x360xf32>, vector<14x360xf32> -> vector<14x360xf32>
    %c0_57 = arith.constant 0 : index
    %c0_58 = arith.constant 0 : index
    %c0_59 = arith.constant 0 : index
    %82 = vector.load %arg10[%c0_57, %c0_58, %c0_59] : memref<3x30x14xf32, #tpu.memory_space<vmem>>, vector<1x30x14xf32>
    %83 = vector.shape_cast %82 : vector<1x30x14xf32> to vector<30x14xf32>
    %84 = vector.extract_strided_slice %81 {offsets = [0, 0], sizes = [14, 120], strides = [1, 1]} : vector<14x360xf32> to vector<14x120xf32>
    %cst_60 = arith.constant dense<0.000000e+00> : vector<30x120xf32>
    %85 = tpu.matmul %83, %84, %cst_60 {dimension_numbers = #tpu.dot_dimension_numbers<[1], [0], [0], [1], [0, 0, 1, 1], [], []>} : vector<30x14xf32>, vector<14x120xf32>, vector<30x120xf32> -> vector<30x120xf32>
    %c1_61 = arith.constant 1 : index
    %c0_62 = arith.constant 0 : index
    %c0_63 = arith.constant 0 : index
    %86 = vector.load %arg10[%c1_61, %c0_62, %c0_63] : memref<3x30x14xf32, #tpu.memory_space<vmem>>, vector<1x30x14xf32>
    %87 = vector.shape_cast %86 : vector<1x30x14xf32> to vector<30x14xf32>
    %88 = vector.extract_strided_slice %81 {offsets = [0, 120], sizes = [14, 120], strides = [1, 1]} : vector<14x360xf32> to vector<14x120xf32>
    %cst_64 = arith.constant dense<0.000000e+00> : vector<30x120xf32>
    %89 = tpu.matmul %87, %88, %cst_64 {dimension_numbers = #tpu.dot_dimension_numbers<[1], [0], [0], [1], [0, 0, 1, 1], [], []>} : vector<30x14xf32>, vector<14x120xf32>, vector<30x120xf32> -> vector<30x120xf32>
    %90 = arith.addf %85, %89 : vector<30x120xf32>
    %c2_65 = arith.constant 2 : index
    %c0_66 = arith.constant 0 : index
    %c0_67 = arith.constant 0 : index
    %91 = vector.load %arg10[%c2_65, %c0_66, %c0_67] : memref<3x30x14xf32, #tpu.memory_space<vmem>>, vector<1x30x14xf32>
    %92 = vector.shape_cast %91 : vector<1x30x14xf32> to vector<30x14xf32>
    %93 = vector.extract_strided_slice %81 {offsets = [0, 240], sizes = [14, 120], strides = [1, 1]} : vector<14x360xf32> to vector<14x120xf32>
    %cst_68 = arith.constant dense<0.000000e+00> : vector<30x120xf32>
    %94 = tpu.matmul %92, %93, %cst_68 {dimension_numbers = #tpu.dot_dimension_numbers<[1], [0], [0], [1], [0, 0, 1, 1], [], []>} : vector<30x14xf32>, vector<14x120xf32>, vector<30x120xf32> -> vector<30x120xf32>
    %95 = arith.addf %90, %94 : vector<30x120xf32>
    %c0_69 = arith.constant 0 : index
    %c0_70 = arith.constant 0 : index
    %96 = vector.load %arg12[%c0_69, %c0_70] : memref<120x8xf32, #tpu.memory_space<vmem>>, vector<120x8xf32>
    %cst_71 = arith.constant dense<0.000000e+00> : vector<120xf32>
    %97 = vector.multi_reduction <add>, %95, %cst_71 [0] : vector<30x120xf32> to vector<120xf32>
    %98 = vector.shape_cast %97 : vector<120xf32> to vector<1x120xf32>
    %99 = arith.mulf %95, %95 : vector<30x120xf32>
    %cst_72 = arith.constant dense<0.000000e+00> : vector<120xf32>
    %100 = vector.multi_reduction <add>, %99, %cst_72 [0] : vector<30x120xf32> to vector<120xf32>
    %101 = vector.shape_cast %100 : vector<120xf32> to vector<1x120xf32>
    %102 = tpu.concatenate %98, %101 in 0 : vector<1x120xf32>, vector<1x120xf32> -> vector<2x120xf32>
    %cst_73 = arith.constant dense<0.000000e+00> : vector<2x8xf32>
    %103 = tpu.matmul %102, %96, %cst_73 {dimension_numbers = #tpu.dot_dimension_numbers<[1], [0], [0], [1], [0, 0, 1, 1], [], []>} : vector<2x120xf32>, vector<120x8xf32>, vector<2x8xf32> -> vector<2x8xf32>
    %cst_74 = arith.constant 0.00222222228 : f32
    %104 = vector.broadcast %cst_74 : f32 to vector<2x8xf32>
    %105 = arith.mulf %103, %104 : vector<2x8xf32>
    %106 = vector.extract_strided_slice %105 {offsets = [0, 0], sizes = [1, 8], strides = [1, 1]} : vector<2x8xf32> to vector<1x8xf32>
    %107 = vector.extract_strided_slice %105 {offsets = [1, 0], sizes = [1, 8], strides = [1, 1]} : vector<2x8xf32> to vector<1x8xf32>
    %108 = arith.mulf %106, %106 : vector<1x8xf32>
    %109 = arith.subf %107, %108 : vector<1x8xf32>
    %cst_75 = arith.constant 0.000000e+00 : f32
    %110 = vector.broadcast %cst_75 : f32 to vector<1x8xf32>
    %111 = arith.maximumf %109, %110 : vector<1x8xf32>
    %c0_76 = arith.constant 0 : index
    %c0_77 = arith.constant 0 : index
    %112 = vector.load %arg13[%c0_76, %c0_77] : memref<1x8xf32, #tpu.memory_space<vmem>>, vector<1x8xf32>
    %cst_78 = arith.constant 9.99999974E-6 : f32
    %113 = vector.broadcast %cst_78 : f32 to vector<1x8xf32>
    %114 = arith.addf %111, %113 : vector<1x8xf32>
    %115 = math.rsqrt %114 : vector<1x8xf32>
    %116 = arith.mulf %112, %115 : vector<1x8xf32>
    %c0_79 = arith.constant 0 : index
    %c0_80 = arith.constant 0 : index
    %117 = vector.load %arg14[%c0_79, %c0_80] : memref<1x8xf32, #tpu.memory_space<vmem>>, vector<1x8xf32>
    %118 = arith.mulf %106, %116 : vector<1x8xf32>
    %119 = arith.subf %117, %118 : vector<1x8xf32>
    %120 = tpu.concatenate %116, %116, %116, %116, %116, %116, %116, %116, %116, %116, %116, %116, %116, %116, %116 in 1 : vector<1x8xf32>, vector<1x8xf32>, vector<1x8xf32>, vector<1x8xf32>, vector<1x8xf32>, vector<1x8xf32>, vector<1x8xf32>, vector<1x8xf32>, vector<1x8xf32>, vector<1x8xf32>, vector<1x8xf32>, vector<1x8xf32>, vector<1x8xf32>, vector<1x8xf32>, vector<1x8xf32> -> vector<1x120xf32>
    %121 = tpu.concatenate %119, %119, %119, %119, %119, %119, %119, %119, %119, %119, %119, %119, %119, %119, %119 in 1 : vector<1x8xf32>, vector<1x8xf32>, vector<1x8xf32>, vector<1x8xf32>, vector<1x8xf32>, vector<1x8xf32>, vector<1x8xf32>, vector<1x8xf32>, vector<1x8xf32>, vector<1x8xf32>, vector<1x8xf32>, vector<1x8xf32>, vector<1x8xf32>, vector<1x8xf32>, vector<1x8xf32> -> vector<1x120xf32>
    %122 = vector.broadcast %120 : vector<1x120xf32> to vector<30x120xf32>
    %123 = arith.mulf %95, %122 : vector<30x120xf32>
    %124 = vector.broadcast %121 : vector<1x120xf32> to vector<30x120xf32>
    %125 = arith.addf %123, %124 : vector<30x120xf32>
    %cst_81 = arith.constant 0.000000e+00 : f32
    %126 = vector.broadcast %cst_81 : f32 to vector<30x120xf32>
    %127 = arith.maximumf %125, %126 : vector<30x120xf32>
    %c0_82 = arith.constant 0 : index
    %c0_83 = arith.constant 0 : index
    %128 = vector.load %arg16[%c0_82, %c0_83] : memref<120x84xf32, #tpu.memory_space<vmem>>, vector<120x84xf32>
    %cst_84 = arith.constant dense<0.000000e+00> : vector<30x84xf32>
    %129 = tpu.matmul %127, %128, %cst_84 {dimension_numbers = #tpu.dot_dimension_numbers<[1], [0], [0], [1], [0, 0, 1, 1], [], []>} : vector<30x120xf32>, vector<120x84xf32>, vector<30x84xf32> -> vector<30x84xf32>
    %c0_85 = arith.constant 0 : index
    %c0_86 = arith.constant 0 : index
    %c0_87 = arith.constant 0 : index
    %130 = vector.load %arg15[%c0_85, %c0_86, %c0_87] : memref<3x56x30xf32, #tpu.memory_space<vmem>>, vector<1x56x30xf32>
    %131 = vector.shape_cast %130 : vector<1x56x30xf32> to vector<56x30xf32>
    %132 = vector.extract_strided_slice %129 {offsets = [0, 0], sizes = [30, 28], strides = [1, 1]} : vector<30x84xf32> to vector<30x28xf32>
    %cst_88 = arith.constant dense<0.000000e+00> : vector<56x28xf32>
    %133 = tpu.matmul %131, %132, %cst_88 {dimension_numbers = #tpu.dot_dimension_numbers<[1], [0], [0], [1], [0, 0, 1, 1], [], []>} : vector<56x30xf32>, vector<30x28xf32>, vector<56x28xf32> -> vector<56x28xf32>
    %c1_89 = arith.constant 1 : index
    %c0_90 = arith.constant 0 : index
    %c0_91 = arith.constant 0 : index
    %134 = vector.load %arg15[%c1_89, %c0_90, %c0_91] : memref<3x56x30xf32, #tpu.memory_space<vmem>>, vector<1x56x30xf32>
    %135 = vector.shape_cast %134 : vector<1x56x30xf32> to vector<56x30xf32>
    %136 = vector.extract_strided_slice %129 {offsets = [0, 28], sizes = [30, 28], strides = [1, 1]} : vector<30x84xf32> to vector<30x28xf32>
    %cst_92 = arith.constant dense<0.000000e+00> : vector<56x28xf32>
    %137 = tpu.matmul %135, %136, %cst_92 {dimension_numbers = #tpu.dot_dimension_numbers<[1], [0], [0], [1], [0, 0, 1, 1], [], []>} : vector<56x30xf32>, vector<30x28xf32>, vector<56x28xf32> -> vector<56x28xf32>
    %138 = arith.addf %133, %137 : vector<56x28xf32>
    %c2_93 = arith.constant 2 : index
    %c0_94 = arith.constant 0 : index
    %c0_95 = arith.constant 0 : index
    %139 = vector.load %arg15[%c2_93, %c0_94, %c0_95] : memref<3x56x30xf32, #tpu.memory_space<vmem>>, vector<1x56x30xf32>
    %140 = vector.shape_cast %139 : vector<1x56x30xf32> to vector<56x30xf32>
    %141 = vector.extract_strided_slice %129 {offsets = [0, 56], sizes = [30, 28], strides = [1, 1]} : vector<30x84xf32> to vector<30x28xf32>
    %cst_96 = arith.constant dense<0.000000e+00> : vector<56x28xf32>
    %142 = tpu.matmul %140, %141, %cst_96 {dimension_numbers = #tpu.dot_dimension_numbers<[1], [0], [0], [1], [0, 0, 1, 1], [], []>} : vector<56x30xf32>, vector<30x28xf32>, vector<56x28xf32> -> vector<56x28xf32>
    %143 = arith.addf %138, %142 : vector<56x28xf32>
    %c0_97 = arith.constant 0 : index
    %c0_98 = arith.constant 0 : index
    %144 = vector.load %arg17[%c0_97, %c0_98] : memref<1x28xf32, #tpu.memory_space<vmem>>, vector<1x28xf32>
    %145 = vector.broadcast %144 : vector<1x28xf32> to vector<56x28xf32>
    %146 = arith.addf %143, %145 : vector<56x28xf32>
    %cst_99 = arith.constant 5.000000e-01 : f32
    %147 = vector.broadcast %cst_99 : f32 to vector<56x28xf32>
    %148 = arith.mulf %147, %146 : vector<56x28xf32>
    %149 = math.tanh %148 : vector<56x28xf32>
    %cst_100 = arith.constant 5.000000e-01 : f32
    %150 = vector.broadcast %cst_100 : f32 to vector<56x28xf32>
    %151 = arith.mulf %150, %149 : vector<56x28xf32>
    %cst_101 = arith.constant 5.000000e-01 : f32
    %152 = vector.broadcast %cst_101 : f32 to vector<56x28xf32>
    %153 = arith.addf %151, %152 : vector<56x28xf32>
    %c0_102 = arith.constant 0 : index
    %c0_103 = arith.constant 0 : index
    %154 = vector.load %arg18[%c0_102, %c0_103] : memref<56x28xf32, #tpu.memory_space<vmem>>, vector<56x28xf32>
    tpu.vector_store %arg18[%c0_102, %c0_103], %153 {strides = array<i32>} : memref<56x28xf32, #tpu.memory_space<vmem>>, vector<56x28xf32>,
    return
  }
}

</mosaic_0001>

<bundles_post_ra>
// kernel: decoder_forward.1
= control target key start
LH: loop header
LB: loop body
LE: loop exit
PB: predicated region body
PF: predicated region fallthrough
CT: control target
= control target key end

     0   :  { %s2536_s0 = inlined_call_operand.vmem [shape: f32[2,32], index: 0, kind: input, shape index: {}]   ;;  %s2537_s1 = inlined_call_operand.vmem [shape: f32[32,96], index: 1, kind: input, shape index: {}]   ;;  %s2538_s2 = inlined_call_operand.vmem [shape: f32[1,96], index: 2, kind: input, shape index: {}]   ;;  %s2539_s3 = inlined_call_operand.hbm [shape: f32[3,96,96], index: 3, kind: input, shape index: {}]   ;;  %s2540_s4 = inlined_call_operand.vmem [shape: f32[3,1,96], index: 4, kind: input, shape index: {}]   ;;  %s2541_s5 = inlined_call_operand.vmem [shape: f32[3,14,6], index: 5, kind: input, shape index: {}]   ;;  %s2542_s6 = inlined_call_operand.hbm [shape: f32[96,336], index: 6, kind: input, shape index: {}]   ;;  %s2543_s7 = inlined_call_operand.vmem [shape: f32[112,16], index: 7, kind: input, shape index: {}]   ;;  %s2544_s8 = inlined_call_operand.vmem [shape: f32[1,16], index: 8, kind: input, shape index: {}]   ;;  %s2545_s9 = inlined_call_operand.vmem [shape: f32[1,16], index: 9, kind: input, shape index: {}]   ;;  %s2546_s10 = inlined_call_operand.vmem [shape: f32[3,30,14], index: 10, kind: input, shape index: {}]   ;;  %s2547_s11 = inlined_call_operand.vmem [shape: f32[112,360], index: 11, kind: input, shape index: {}]   ;;  %s2548_s12 = inlined_call_operand.vmem [shape: f32[120,8], index: 12, kind: input, shape index: {}]   ;;  %s2549_s13 = inlined_call_operand.vmem [shape: f32[1,8], index: 13, kind: input, shape index: {}]   ;;  %s2550_s14 = inlined_call_operand.vmem [shape: f32[1,8], index: 14, kind: input, shape index: {}]   ;;  %s2551_s15 = inlined_call_operand.vmem [shape: f32[3,56,30], index: 15, kind: input, shape index: {}]   ;;  %s2552_s16 = inlined_call_operand.vmem [shape: f32[120,84], index: 16, kind: input, shape index: {}]   ;;  %s2553_s17 = inlined_call_operand.vmem [shape: f32[1,28], index: 17, kind: input, shape index: {}]   ;;  %s2554_s18 = inlined_call_operand.hbm [shape: f32[56,28], index: 18, kind: output, shape index: {}]  }
   0x1   :  { %2556 = sst [smem:[#allocation11_spill]] %s2536_s0 }
   0x2   :  { %2557 = sst [smem:[#allocation12_spill]] %s2537_s1 }
   0x3   :  { %2558 = sst [smem:[#allocation13_spill]] %s2538_s2 }
   0x4   :  { %23 = vsyncpa [#allocation3], 0 }
   0x5   :  { %24 = vsyncpa [#allocation6], 0 }
   0x6   :  { %25 = vsyncpa [#allocation4], 0  ;;  %s36_s29 = sshll.u32 %s2539_s3, 4  ;;  %s1753_s30 = smov [#allocation2]   ;;  %s37_s29 = int_to_ptr.hbm [resolvable:$true] %s36_s29 }
   0x7   :  { %s38_s0 = sshll.u32 %s1753_s30, 4  ;;  %s53_s20 = sshll.u32 %s2542_s6, 4  ;;  %s39_s0 = int_to_ptr.vmem [resolvable:$true] %s38_s0  ;;  %s54_s20 = int_to_ptr.hbm [resolvable:$true] %s53_s20 }
   0x8   :  { %s1754_s21 = smov 128   ;;  %s1755_s22 = smov 8  }
   0x9   :  { %44 = dma.hbm_to_vmem [thread:$0]  %s37_s29, 4608, %s39_s0, [#allocation3], %s1754_s21, %s1754_s21, %s1755_s22  }
   0xa   :  { %s1756_s2 = smov [#allocation5]   ;;  %s1757_s24 = smov 384  }
   0xb   :  { %s55_s23 = sshll.u32 %s1756_s2, 4  ;;  %s1758_s3 = smov 24   ;;  %s56_s23 = int_to_ptr.vmem [resolvable:$true] %s55_s23 }
   0xc   :  { %61 = dma.hbm_to_vmem [thread:$0]  %s54_s20, 4608, %s56_s23, [#allocation6], %s1757_s24, %s1757_s24, %s1758_s3  }
   0xd   :  { %1747 = dma.done.wait [#allocation3], 4608  }
   0xe   :  { %1748 = vsyncadd [#allocation3], 4294962688 }
   0xf   :  { %1749 = dma.done.wait [#allocation6], 4608  }
  0x10   :  { %1750 = vsyncadd [#allocation6], 4294962688  ;;  %s2559_s26 = sld [smem:[#allocation12_spill]]  ;;  %v178_v3 = vld [vmem:[#allocation2 + $0xb8] sm:$0xff]  ;;  %v177_v5 = vld [vmem:[#allocation2 + $0xb0] sm:$0xff]  ;;  %vm101_vm0 = vcmask 261120  }
  0x11   :  { %v216_v4 = vld [vmem:[#allocation2 + $0x118] sm:$0xff]  ;;  %188 = vmatpush.msra.mxu2 %v178_v3  ;;  %v215_v6 = vld [vmem:[#allocation2 + $0x110] sm:$0xff]  ;;  %v176_v8 = vld [vmem:[#allocation2 + $0xa8] sm:$0xff]  ;;  %s2560_s2 = sld [smem:[#allocation11_spill]]  ;;  %vm142_vm1 = vcmask 785408   ;;  %vm248_vm2 = vcmask 1041408  }
  0x12   :  { %226 = vmatpush.msra.mxu3 %v216_v4  ;;  %v214_v10 = vld [vmem:[#allocation2 + $0x108] sm:$0xff]  ;;  %v137_v11 = vld [vmem:[#allocation2 + $0x58] sm:$0xff]  ;;  %v175_v12 = vld [vmem:[#allocation2 + $0xa0] sm:$0xff]  ;;  %s2561_s25 = sld [smem:[#allocation13_spill]]  ;;  %vm250_vm3 = vcmask 1043456   ;;  %vm372_vm4 = vcmask 1045504  }
  0x13   :  { %189 = vmatpush.msra.mxu2 %v177_v5  ;;  %v213_v13 = vld [vmem:[#allocation2 + $0x100] sm:$0xff]  ;;  %v136_v14 = vld [vmem:[#allocation2 + $0x50] sm:$0xff]  ;;  %v174_v15 = vld [vmem:[#allocation2 + $0x98] sm:$0xff]  ;;  %s1760_s0 = smov 16   ;;  %vm365_vm5 = vcmask 48128   ;;  %vm363_vm6 = vcmask 130048  }
  0x14   :  { %227 = vmatpush.msra.mxu3 %v215_v6  ;;  %v135_v16 = vld [vmem:[#allocation2 + $0x48] sm:$0xff]  ;;  %v212_v17 = vld [vmem:[#allocation2 + $0xf8] sm:$0xff]  ;;  %v134_v18 = vld [vmem:[#allocation2 + $0x40] sm:$0xff]  ;;  %vm485_vm7 = vcmask 916480   ;;  %vm487_vm8 = vcmask 914432   ;;  %vm507_vm9 = vcmask 1040384  }
  0x15   :  { %190 = vmatpush.msra.mxu2 %v176_v8  ;;  %v173_v19 = vld [vmem:[#allocation2 + $0x90] sm:$0xff]  ;;  %v172_v21 = vld [vmem:[#allocation2 + $0x88] sm:$0xff]  ;;  %v133_v23 = vld [vmem:[#allocation2 + $0x38] sm:$0xff]  ;;  %s1761_s20 = smov 80   ;;  %vm582_vm13 = vcmask 392192   ;;  %vm584_vm14 = vcmask 523264  }
  0x16   :  { %v96_v0 = vld [vmem:[%s2559_s26 + $0x18] sm:$0xff]  ;;  %v95_v1 = vld [vmem:[%s2559_s26 + $0x10] sm:$0xff]  ;;  %v94_v2 = vld [vmem:[%s2559_s26 + $0x8] sm:$0xff]  ;;  %228 = vmatpush.msra.mxu3 %v214_v10  ;;  %vm586_vm15 = vcmask 654336   ;;  %s1766_s6 = smov 72   ;;  %s1768_s27 = smov 88  }
  0x17   :  { %117 = vmatpush.msra.mxu0 %v96_v0  ;;  %v93_v7 = vld [vmem:[%s2559_s26] sm:$0xff]  ;;  %191 = vmatpush.msra.mxu2 %v175_v12  ;;  %v211_v20 = vld [vmem:[#allocation2 + $0xf0] sm:$0xff]  ;;  %v210_v22 = vld [vmem:[#allocation2 + $0xe8] sm:$0xff]  ;;  %s1770_s28 = smov 112  }
  0x18   :  { %v92_v9 = vld [vmem:[%s2560_s2] sm:$0x3]  ;;  %229 = vmatpush.msra.mxu3 %v213_v13  ;;  %v171_v24 = vld [vmem:[#allocation2 + $0x80] sm:$0xff]  ;;  %v132_v26 = vld [vmem:[#allocation2 + $0x30] sm:$0xff]  ;;  %s1762_s2 = smov 48  }
  0x19   :  { %118 = vmatpush.msra.mxu0 %v95_v1  ;;  %192 = vmatpush.msra.mxu2 %v174_v15  ;;  %v209_v25 = vld [vmem:[#allocation2 + $0xe0] sm:$0xff]  ;;  %v170_v27 = vld [vmem:[#allocation2 + $0x78] sm:$0xff]  ;;  %v131_v29 = vld [vmem:[#allocation2 + $0x28] sm:$0xff] }
  0x1a   :  { %230 = vmatpush.msra.mxu3 %v212_v17  ;;  %v208_v28 = vld [vmem:[#allocation2 + $0xd8] sm:$0xff]  ;;  %v130_v30 = vld [vmem:[#allocation2 + $0x20] sm:$0xff]  ;;  %v128_v32 = vld [vmem:[#allocation2 + $0x10] sm:$0xff] }
  0x1b   :  { %119 = vmatpush.msra.mxu0 %v94_v2  ;;  %193 = vmatpush.msra.mxu2 %v173_v19  ;;  %v129_v31 = vld [vmem:[#allocation2 + $0x18] sm:$0xff]  ;;  %v169_v33 = vld [vmem:[#allocation2 + $0x70] sm:$0xff]  ;;  %v127_v35 = vld [vmem:[#allocation2 + $0x8] sm:$0xff] }
  0x1c   :  { %231 = vmatpush.msra.mxu3 %v211_v20  ;;  %v207_v34 = vld [vmem:[#allocation2 + $0xd0] sm:$0xff]  ;;  %v168_v36 = vld [vmem:[#allocation2 + $0x68] sm:$0xff]  ;;  %v126_v38 = vld [vmem:[#allocation2] sm:$0xff] }
  0x1d   :  { %120 = vmatpush.msra.mxu0 %v93_v7  ;;  %194 = vmatpush.msra.mxu2 %v172_v21  ;;  %v206_v37 = vld [vmem:[#allocation2 + $0xc8] sm:$0xff]  ;;  %v167_v39 = vld [vmem:[#allocation2 + $0x60] sm:$0xff]  ;;  %v287_v42 = vld [vmem:[#allocation5 + $0x110] sm:$0xff] }
  0x1e   :  { %1515 = vmatmul.msk.f32.vlgmr.msra.gmra.mxu0 %vm101_vm0, %v92_v9  ;;  %232 = vmatpush.msra.mxu3 %v210_v22  ;;  %v205_v40 = vld [vmem:[#allocation2 + $0xc0] sm:$0xff]  ;;  %v286_v41 = vld [vmem:[#allocation5 + $0x108] sm:$0xff]  ;;  %v288_v43 = vld [vmem:[#allocation5 + $0x118] sm:$0xff] }
  0x1f   :  { %150 = vmatpush.msrb.mxu0 %v137_v11  ;;  %195 = vmatpush.msra.mxu2 %v171_v24  ;;  %v283_v44 = vld [vmem:[#allocation5 + $0xf0] sm:$0xff]  ;;  %v284_v45 = vld [vmem:[#allocation5 + $0xf8] sm:$0xff]  ;;  %v285_v46 = vld [vmem:[#allocation5 + $0x100] sm:$0xff] }
  0x20   :  { %233 = vmatpush.msra.mxu3 %v209_v25  ;;  %316 = vmatpush.msra.mxu1 %v287_v42  ;;  %v280_v47 = vld [vmem:[#allocation5 + $0xd8] sm:$0xff]  ;;  %v281_v48 = vld [vmem:[#allocation5 + $0xe0] sm:$0xff]  ;;  %v282_v49 = vld [vmem:[#allocation5 + $0xe8] sm:$0xff] }
  0x21   :  { %151 = vmatpush.msrb.mxu0 %v136_v14  ;;  %196 = vmatpush.msra.mxu2 %v170_v27  ;;  %v277_v50 = vld [vmem:[#allocation5 + $0xc0] sm:$0xff]  ;;  %v278_v51 = vld [vmem:[#allocation5 + $0xc8] sm:$0xff]  ;;  %v279_v52 = vld [vmem:[#allocation5 + $0xd0] sm:$0xff] }
  0x22   :  { %234 = vmatpush.msra.mxu3 %v208_v28  ;;  %317 = vmatpush.msra.mxu1 %v284_v45  ;;  %v1652_v53 = vld [vmem:[%s2561_s25] ss:$0 sm:$0xff]  ;;  %v274_v57 = vld [vmem:[#allocation5 + $0xa8] sm:$0xff]  ;;  %v275_v58 = vld [vmem:[#allocation5 + $0xb0] sm:$0xff] }
  0x23   :  { %152 = vmatpush.msrb.mxu0 %v135_v16  ;;  %197 = vmatpush.msra.mxu2 %v169_v33  ;;  %v276_v59 = vld [vmem:[#allocation5 + $0xb8] sm:$0xff]  ;;  %v271_v60 = vld [vmem:[#allocation5 + $0x90] sm:$0xff]  ;;  %v273_v62 = vld [vmem:[#allocation5 + $0xa0] sm:$0xff] }
  0x24   :  { %235 = vmatpush.msra.mxu3 %v207_v34  ;;  %318 = vmatpush.msra.mxu1 %v281_v48  ;;  %v272_v61 = vld [vmem:[#allocation5 + $0x98] sm:$0xff]  ;;  %v269_v0 = vld [vmem:[#allocation5 + $0x80] sm:$0xff]  ;;  %v270_v1 = vld [vmem:[#allocation5 + $0x88] sm:$0xff] }
  0x25   :  { %153 = vmatpush.msrb.mxu0 %v134_v18  ;;  %198 = vmatpush.msra.mxu2 %v168_v36  ;;  %v268_v63 = vld [vmem:[#allocation5 + $0x78] sm:$0xff]  ;;  %v265_v2 = vld [vmem:[#allocation5 + $0x60] sm:$0xff]  ;;  %v266_v3 = vld [vmem:[#allocation5 + $0x68] sm:$0xff] }
  0x26   :  { %236 = vmatpush.msra.mxu3 %v206_v37  ;;  %319 = vmatpush.msra.mxu1 %v278_v51  ;;  %v267_v4 = vld [vmem:[#allocation5 + $0x70] sm:$0xff]  ;;  %v262_v5 = vld [vmem:[#allocation5 + $0x48] sm:$0xff]  ;;  %v264_v7 = vld [vmem:[#allocation5 + $0x58] sm:$0xff] }
  0x27   :  { %154 = vmatpush.msrb.mxu0 %v133_v23  ;;  %199 = vmatpush.msra.mxu2 %v167_v39  ;;  %v263_v6 = vld [vmem:[#allocation5 + $0x50] sm:$0xff]  ;;  %v260_v9 = vld [vmem:[#allocation5 + $0x38] sm:$0xff]  ;;  %v261_v10 = vld [vmem:[#allocation5 + $0x40] sm:$0xff] }
  0x28   :  { %237 = vmatpush.msra.mxu3 %v205_v40  ;;  %320 = vmatpush.msra.mxu1 %v275_v58  ;;  %v259_v8 = vld [vmem:[#allocation5 + $0x30] sm:$0xff]  ;;  %v256_v11 = vld [vmem:[#allocation5 + $0x18] sm:$0xff]  ;;  %v257_v12 = vld [vmem:[#allocation5 + $0x20] sm:$0xff] }
  0x29   :  { %155 = vmatpush.msrb.mxu0 %v132_v26  ;;  %336 = vmatpush.msrb.mxu2 %v288_v43  ;;  %v258_v13 = vld [vmem:[#allocation5 + $0x28] sm:$0xff]  ;;  %v253_v14 = vld [vmem:[#allocation5] sm:$0xff]  ;;  %v255_v16 = vld [vmem:[#allocation5 + $0x10] sm:$0xff] }
  0x2a   :  { %321 = vmatpush.msra.mxu1 %v272_v61  ;;  %v254_v15 = vld [vmem:[#allocation5 + $0x8] sm:$0xff]  ;;  %v1654_v17 = vld [vmem:[%s2540_s4 + $0x1] ss:$0 sm:$0xff]  ;;  %v1655_v18 = vld [vmem:[%s2540_s4 + $0x2] ss:$0 sm:$0xff] }
  0x2b   :  { %156 = vmatpush.msrb.mxu0 %v131_v29  ;;  %337 = vmatpush.msrb.mxu2 %v285_v46  ;;  %v1653_v19 = vld [vmem:[%s2540_s4] ss:$0 sm:$0xff]  ;;  %s1759_s4 = smov 32   ;;  %v1524_v40 = vld [vmem:[%s2541_s5 + $0x10] sm:$0xff]  ;;  %v1525_v43 = vld [vmem:[%s2541_s5 + $0x18] sm:$0x3f] }
  0x2c   :  { %322 = vmatpush.msra.mxu1 %v269_v0  ;;  %v352_v34 = vld [vmem:[%s2541_s5] sm:$0xff]  ;;  %v1533_v45 = vld [vmem:[%s2541_s5 + $0x28] sm:$0x3f]  ;;  %v482_v48 = vld [vmem:[%s2543_s7 + $0x58] sm:$0xff] }
  0x2d   :  { %157 = vmatpush.msrb.mxu0 %v130_v30  ;;  %338 = vmatpush.msrb.mxu2 %v282_v49  ;;  %v484_v46 = vld [vmem:[%s2543_s7 + $0x68] sm:$0xff]  ;;  %v481_v49 = vld [vmem:[%s2543_s7 + $0x50] sm:$0xff]  ;;  %v479_v51 = vld [vmem:[%s2543_s7 + $0x40] sm:$0xff] }
  0x2e   :  { %323 = vmatpush.msra.mxu1 %v266_v3  ;;  %v473_v58 = vld [vmem:[%s2543_s7 + $0x10] sm:$0xff] }
  0x2f   :  { %158 = vmatpush.msrb.mxu0 %v129_v31  ;;  %339 = vmatpush.msrb.mxu2 %v279_v52  ;;  %v478_v52 = vld [vmem:[%s2543_s7 + $0x38] sm:$0xff] }
  0x30   :  { %324 = vmatpush.msra.mxu1 %v263_v6 }
  0x31   :  { %159 = vmatpush.msrb.mxu0 %v128_v32  ;;  %340 = vmatpush.msrb.mxu2 %v276_v59 }
  0x32   :  { %325 = vmatpush.msra.mxu1 %v260_v9 }
  0x33   :  { %160 = vmatpush.msrb.mxu0 %v127_v35  ;;  %341 = vmatpush.msrb.mxu2 %v273_v62  ;;  %v353_v35 = vld [vmem:[%s2541_s5 + $0x8] sm:$0x3f]  ;;  %v471_v62 = vld [vmem:[%s2543_s7] sm:$0xff] }
  0x34   :  { %326 = vmatpush.msra.mxu1 %v257_v12 }
  0x35   :  { %161 = vmatpush.msrb.mxu0 %v126_v38  ;;  %342 = vmatpush.msrb.mxu2 %v270_v1 }
  0x36   :  { %327 = vmatpush.msra.mxu1 %v254_v15 }
  0x37   :  { %296 = vmatpush.msra.mxu0 %v286_v41  ;;  %343 = vmatpush.msrb.mxu2 %v267_v4 }
  0x39   :  { %297 = vmatpush.msra.mxu0 %v283_v44  ;;  %344 = vmatpush.msrb.mxu2 %v264_v7  ;;  %v1532_v44 = vld [vmem:[%s2541_s5 + $0x20] sm:$0xff]  ;;  %s1765_s5 = smov 40  }
  0x3b   :  { %298 = vmatpush.msra.mxu0 %v280_v47  ;;  %345 = vmatpush.msrb.mxu2 %v261_v10  ;;  %v483_v47 = vld [vmem:[%s2543_s7 + $0x60] sm:$0xff] }
  0x3d   :  { %299 = vmatpush.msra.mxu0 %v277_v50  ;;  %346 = vmatpush.msrb.mxu2 %v258_v13  ;;  %v480_v50 = vld [vmem:[%s2543_s7 + $0x48] sm:$0xff] }
  0x3f   :  { %300 = vmatpush.msra.mxu0 %v274_v57  ;;  %347 = vmatpush.msrb.mxu2 %v255_v16  ;;  %v474_v57 = vld [vmem:[%s2543_s7 + $0x18] sm:$0xff] }
  0x41   :  { %301 = vmatpush.msra.mxu0 %v271_v60  ;;  %v472_v60 = vld [vmem:[%s2543_s7 + $0x8] sm:$0xff] }
  0x43   :  { %302 = vmatpush.msra.mxu0 %v268_v63 }
  0x45   :  { %303 = vmatpush.msra.mxu0 %v265_v2 }
  0x47   :  { %304 = vmatpush.msra.mxu0 %v262_v5 }
  0x49   :  { %305 = vmatpush.msra.mxu0 %v259_v8 }
  0x4b   :  { %306 = vmatpush.msra.mxu0 %v256_v11 }
  0x4d   :  { %307 = vmatpush.msra.mxu0 %v253_v14 }
  0x9b   :  { %v122_v54 = vpop.f32.mrf.mxu0 }
  0x9c   :  { %v123_v55 = vadd.f32 %v1652_v53, %v122_v54  ;;  %v477_v54 = vld [vmem:[%s2543_s7 + $0x30] sm:$0xff] }
  0x9e   :  { %v125_v56 = vmax.f32 %v123_v55, 0.0  ;;  %v476_v55 = vld [vmem:[%s2543_s7 + $0x28] sm:$0xff] }
  0xa0   :  { %1516 = vmatmul.msk.f32.vlgmr.msrb.gmra.mxu0 %vm142_vm1, %v125_v56  ;;  %1518 = vmatmul.msk.f32.vlgmr.msra.gmra.mxu2 %vm142_vm1, %v125_v56 }
  0xa1   :  { %1520 = vmatmul.msk.f32.vlgmr.msra.gmra.mxu3 %vm142_vm1, %v125_v56  ;;  %v475_v56 = vld [vmem:[%s2543_s7 + $0x20] sm:$0xff] }
 0x11d   :  { %v163_v20 = vpop.f32.mrf.mxu0 }
 0x11e   :  { %v164_v25 = vadd.f32 %v1653_v19, %v163_v20 }
 0x123   :  { %v201_v21 = vpop.f32.mrf.mxu2 }
 0x124   :  { %v202_v22 = vadd.f32 %v1654_v17, %v201_v21  ;;  %v239_v23 = vpop.f32.mrf.mxu3 }
 0x125   :  { %v240_v24 = vadd.f32 %v1655_v18, %v239_v23 }
 0x126   :  { %v243_v26 = vrot.slane %v202_v22, 6 }
 0x127   :  { %v246_v27 = vrot.slane %v240_v24, 4 }
 0x128   :  { %v249_v28 = vsel %vm248_vm2, %v164_v25, %v243_v26  ;;  %vm765_vm2 = vcmask 113664  }
 0x129   :  { %v251_v29 = vsel %vm250_vm3, %v249_v28, %v246_v27  ;;  %vm761_vm3 = vcmask 64512  }
 0x12a   :  { %v252_v30 = vmax.f32 %v251_v29, 0.0 }
 0x12c   :  { %1521 = vmatmul.msk.f32.vlgmr.msra.gmra.mxu0 %vm142_vm1, %v252_v30  ;;  %1522 = vmatmul.msk.f32.vlgmr.msra.gmra.mxu1 %vm142_vm1, %v252_v30 }
 0x12d   :  { %1523 = vmatmul.msk.f32.vlgmr.msrb.gmra.mxu2 %vm142_vm1, %v252_v30 }
 0x1a9   :  { %v309_v31 = vpop.f32.mrf.mxu0  ;;  %v329_v32 = vpop.f32.mrf.mxu1 }
 0x1aa   :  { %433 = vrot.lane.b32.xlu1 %v329_v32, %s1759_s4  ;;  %359 = vrot.lane.b32.xlu0 %v309_v31, %s1760_s0 }
 0x1ab   :  { %1529 = vmatpush.msk.msrb.mxu0 %vm372_vm4, %v309_v31 }
 0x1ac   :  { %1530 = vmatmul.msk.f32.vlgmr.msrb.gmra.mxu0 %vm365_vm5, %v352_v34 }
 0x1ad   :  { %514 = vmatpush.msra.mxu0 %v484_v46  ;;  %v557_v46 = vld [vmem:[%s2545_s9] sm:$0x1]  ;;  %s1764_s9 = smov 64  }
 0x1af   :  { %515 = vmatpush.msra.mxu0 %v483_v47 }
 0x1b0   :  { %v349_v33 = vpop.f32.mrf.mxu2 }
 0x1b1   :  { %516 = vmatpush.msra.mxu0 %v482_v48 }
 0x1b2   :  { %435 = vrot.lane.b32.xlu1 %v349_v33, %s1759_s4  ;;  %361 = vrot.lane.b32.xlu0 %v329_v32, %s1760_s0 }
 0x1b3   :  { %517 = vmatpush.msra.mxu0 %v481_v49  ;;  %v662_v49 = vld [vmem:[%s2547_s11 + $0x138] sm:$0xff] }
 0x1b4   :  { %1531 = vmatmul.msk.f32.gmra.mxu0 %vm365_vm5, %v353_v35  ;;  %673 = vmatpush.msrb.mxu1 %v662_v49 }
 0x1b5   :  { %518 = vmatpush.msra.mxu0 %v480_v50  ;;  %v663_v50 = vld [vmem:[%s2547_s11 + $0x140] sm:$0xff] }
 0x1b6   :  { %696 = vmatpush.msra.mxu2 %v663_v50 }
 0x1b7   :  { %519 = vmatpush.msra.mxu0 %v479_v51  ;;  %v664_v51 = vld [vmem:[%s2547_s11 + $0x148] sm:$0xff] }
 0x1b9   :  { %520 = vmatpush.msra.mxu0 %v478_v52  ;;  %v659_v52 = vld [vmem:[%s2547_s11 + $0x120] sm:$0xff] }
 0x1ba   :  { %674 = vmatpush.msrb.mxu1 %v659_v52 }
 0x1bb   :  { %521 = vmatpush.msra.mxu0 %v477_v54  ;;  %v661_v54 = vld [vmem:[%s2547_s11 + $0x130] sm:$0xff] }
 0x1bd   :  { %522 = vmatpush.msra.mxu0 %v476_v55  ;;  %v656_v55 = vld [vmem:[%s2547_s11 + $0x108] sm:$0xff] }
 0x1be   :  { %675 = vmatpush.msrb.mxu1 %v656_v55 }
 0x1bf   :  { %523 = vmatpush.msra.mxu0 %v475_v56  ;;  %v657_v56 = vld [vmem:[%s2547_s11 + $0x110] sm:$0xff] }
 0x1c1   :  { %524 = vmatpush.msra.mxu0 %v474_v57  ;;  %v658_v57 = vld [vmem:[%s2547_s11 + $0x118] sm:$0xff] }
 0x1c3   :  { %525 = vmatpush.msra.mxu0 %v473_v58  ;;  %v653_v58 = vld [vmem:[%s2547_s11 + $0xf0] sm:$0xff] }
 0x1c4   :  { %676 = vmatpush.msrb.mxu1 %v653_v58 }
 0x1c5   :  { %526 = vmatpush.msra.mxu0 %v472_v60  ;;  %v655_v60 = vld [vmem:[%s2547_s11 + $0x100] sm:$0xff] }
 0x1c7   :  { %527 = vmatpush.msra.mxu0 %v471_v62  ;;  %v651_v62 = vld [vmem:[%s2547_s11 + $0xe0] sm:$0xff] }
 0x21c   :  { %v434_v36 = vpop.permute.xlu1 %433  ;;  %v360_v37 = vpop.permute.xlu0 %359 }
 0x224   :  { %v436_v38 = vpop.permute.xlu1 %435  ;;  %v362_v39 = vpop.permute.xlu0 %361 }
 0x225   :  { %v437_v41 = vsel %vm101_vm0, %v434_v36, %v436_v38  ;;  %v364_v42 = vsel %vm363_vm6, %v360_v37, %v362_v39 }
 0x226   :  { %1526 = vmatpush.msk.msrb.mxu3 %vm372_vm4, %v364_v42 }
 0x227   :  { %1527 = vmatmul.msk.f32.vlgmr.msrb.gmra.mxu3 %vm365_vm5, %v1524_v40 }
 0x228   :  { %1534 = vmatpush.msk.msra.mxu3 %vm372_vm4, %v437_v41  ;;  %v539_v41 = vld [vmem:[%s2544_s8] sm:$0x1]  ;;  %s1763_s8 = smov 96  }
 0x229   :  { %v423_v61 = vpop.f32.mrf.mxu0 }
 0x22a   :  { %719 = vmatpush.msrb.mxu3 %v664_v51 }
 0x22c   :  { %720 = vmatpush.msrb.mxu3 %v661_v54 }
 0x22e   :  { %721 = vmatpush.msrb.mxu3 %v658_v57 }
 0x22f   :  { %1528 = vmatmul.msk.f32.gmra.mxu3 %vm365_vm5, %v1525_v43 }
 0x230   :  { %722 = vmatpush.msrb.mxu3 %v655_v60 }
 0x231   :  { %v426_v1 = vpop.f32.mrf.mxu0 }
 0x237   :  { %1535 = vmatmul.msk.f32.vlgmr.msra.gmra.mxu3 %vm365_vm5, %v1532_v44 }
 0x23f   :  { %1536 = vmatmul.msk.f32.gmra.mxu3 %vm365_vm5, %v1533_v45  ;;  %vm932_vm5 = vcmask 982016  }
 0x2aa   :  { %v392_v53 = vpop.f32.mrf.mxu3 }
 0x2ab   :  { %v424_v0 = vadd.f32 %v423_v61, %v392_v53  ;;  %v660_v53 = vld [vmem:[%s2547_s11 + $0x128] sm:$0xff]  ;;  %v650_v61 = vld [vmem:[%s2547_s11 + $0xd8] sm:$0xff] }
 0x2ac   :  { %697 = vmatpush.msra.mxu2 %v660_v53  ;;  %677 = vmatpush.msrb.mxu1 %v650_v61 }
 0x2ae   :  { %698 = vmatpush.msra.mxu2 %v657_v56 }
 0x2b2   :  { %v395_v59 = vpop.f32.mrf.mxu3 }
 0x2b3   :  { %v427_v3 = vadd.f32 %v426_v1, %v395_v59  ;;  %v654_v59 = vld [vmem:[%s2547_s11 + $0xf8] sm:$0xff]  ;;  %v648_v1 = vld [vmem:[%s2547_s11 + $0xc8] sm:$0xff] }
 0x2b4   :  { %699 = vmatpush.msra.mxu2 %v654_v59 }
 0x2b6   :  { %700 = vmatpush.msra.mxu2 %v651_v62 }
 0x2b8   :  { %701 = vmatpush.msra.mxu2 %v648_v1 }
 0x2ba   :  { %v463_v63 = vpop.f32.mrf.mxu3 }
 0x2bb   :  { %v1987_v2 = vadd.f32 %v463_v63, %v424_v0  ;;  %v652_v63 = vld [vmem:[%s2547_s11 + $0xe8] sm:$0xff]  ;;  %v647_v0 = vld [vmem:[%s2547_s11 + $0xc0] sm:$0xff] }
 0x2bc   :  { %723 = vmatpush.msrb.mxu3 %v652_v63  ;;  %678 = vmatpush.msrb.mxu1 %v647_v0 }
 0x2bd   :  { %v496_v5 = vmul.f32 %v1987_v2, %v1987_v2  ;;  %v486_v7 = vsel %vm485_vm7, %v1987_v2, 0.0 }
 0x2bf   :  { %v498_v11 = vsel %vm485_vm7, %v496_v5, 0.0  ;;  %v644_v5 = vld [vmem:[%s2547_s11 + $0xa8] sm:$0xff] }
 0x2c0   :  { %679 = vmatpush.msrb.mxu1 %v644_v5  ;;  %v741_v5 = vld [vmem:[%s2546_s10 + $0x8] sm:$0xff] }
 0x2c2   :  { %v466_v4 = vpop.f32.mrf.mxu3 }
 0x2c3   :  { %v1991_v6 = vadd.f32 %v466_v4, %v427_v3  ;;  %v649_v3 = vld [vmem:[%s2547_s11 + $0xd0] sm:$0xff] }
 0x2c4   :  { %724 = vmatpush.msrb.mxu3 %v649_v3 }
 0x2c5   :  { %v488_v8 = vsel %vm487_vm8, %v1991_v6, 0.0  ;;  %v497_v9 = vmul.f32 %v1991_v6, %v1991_v6 }
 0x2c6   :  { %v489_v10 = vadd.f32 %v488_v8, %v486_v7  ;;  %v645_v7 = vld [vmem:[%s2547_s11 + $0xb0] sm:$0xff]  ;;  %v646_v8 = vld [vmem:[%s2547_s11 + $0xb8] sm:$0xff] }
 0x2c7   :  { %v499_v12 = vsel %vm487_vm8, %v497_v9, 0.0  ;;  %702 = vmatpush.msra.mxu2 %v645_v7  ;;  %725 = vmatpush.msrb.mxu3 %v646_v8  ;;  %v641_v9 = vld [vmem:[%s2547_s11 + $0x90] sm:$0xff]  ;;  %v743_v8 = vld [vmem:[%s2546_s10 + $0x18] sm:$0x3f]  ;;  %vm938_vm8 = vcmask 979968  }
 0x2c8   :  { %v490_v13 = vrot.slane %v489_v10, 4  ;;  %v500_v14 = vadd.f32 %v499_v12, %v498_v11  ;;  %v643_v11 = vld [vmem:[%s2547_s11 + $0xa0] sm:$0xff]  ;;  %680 = vmatpush.msrb.mxu1 %v641_v9  ;;  %v638_v12 = vld [vmem:[%s2547_s11 + $0x78] sm:$0xff]  ;;  %v742_v7 = vld [vmem:[%s2546_s10 + $0x10] sm:$0xff] }
 0x2c9   :  { %726 = vmatpush.msrb.mxu3 %v643_v11 }
 0x2ca   :  { %v491_v15 = vadd.f32 %v490_v13, %v489_v10  ;;  %v501_v16 = vrot.slane %v500_v14, 4  ;;  %v642_v10 = vld [vmem:[%s2547_s11 + $0x98] sm:$0xff]  ;;  %v639_v13 = vld [vmem:[%s2547_s11 + $0x80] sm:$0xff]  ;;  %681 = vmatpush.msrb.mxu1 %v638_v12 }
 0x2cb   :  { %703 = vmatpush.msra.mxu2 %v642_v10 }
 0x2cc   :  { %v492_v17 = vrot.slane %v491_v15, 2  ;;  %v502_v18 = vadd.f32 %v501_v16, %v500_v14  ;;  %v640_v14 = vld [vmem:[%s2547_s11 + $0x88] sm:$0xff] }
 0x2cd   :  { %v636_v16 = vld [vmem:[%s2547_s11 + $0x68] sm:$0xff]  ;;  %704 = vmatpush.msra.mxu2 %v639_v13  ;;  %727 = vmatpush.msrb.mxu3 %v640_v14 }
 0x2ce   :  { %v493_v19 = vadd.f32 %v492_v17, %v491_v15  ;;  %v503_v20 = vrot.slane %v502_v18, 2  ;;  %v635_v15 = vld [vmem:[%s2547_s11 + $0x60] sm:$0xff]  ;;  %v637_v17 = vld [vmem:[%s2547_s11 + $0x70] sm:$0xff] }
 0x2cf   :  { %682 = vmatpush.msrb.mxu1 %v635_v15  ;;  %705 = vmatpush.msra.mxu2 %v636_v16  ;;  %v1544_v15 = vld [vmem:[%s2546_s10 + $0x20] sm:$0xff] }
 0x2d0   :  { %v494_v21 = vrot.slane %v493_v19, 1  ;;  %v504_v22 = vadd.f32 %v503_v20, %v502_v18  ;;  %728 = vmatpush.msrb.mxu3 %v637_v17  ;;  %v633_v20 = vld [vmem:[%s2547_s11 + $0x50] sm:$0xff] }
 0x2d1   :  { %706 = vmatpush.msra.mxu2 %v633_v20 }
 0x2d2   :  { %v505_v23 = vrot.slane %v504_v22, 1  ;;  %v495_v24 = vadd.f32 %v494_v21, %v493_v19  ;;  %v632_v19 = vld [vmem:[%s2547_s11 + $0x48] sm:$0xff]  ;;  %v634_v21 = vld [vmem:[%s2547_s11 + $0x58] sm:$0xff] }
 0x2d3   :  { %683 = vmatpush.msrb.mxu1 %v632_v19  ;;  %729 = vmatpush.msrb.mxu3 %v634_v21 }
 0x2d4   :  { %v506_v25 = vadd.f32 %v505_v23, %v504_v22  ;;  %v629_v22 = vld [vmem:[%s2547_s11 + $0x30] sm:$0xff]  ;;  %v630_v23 = vld [vmem:[%s2547_s11 + $0x38] sm:$0xff] }
 0x2d5   :  { %684 = vmatpush.msrb.mxu1 %v629_v22  ;;  %707 = vmatpush.msra.mxu2 %v630_v23  ;;  %v1545_v23 = vld [vmem:[%s2546_s10 + $0x28] sm:$0xff] }
 0x2d6   :  { %v508_v26 = vsel %vm507_vm9, %v495_v24, %v506_v25  ;;  %v631_v24 = vld [vmem:[%s2547_s11 + $0x40] sm:$0xff]  ;;  %v626_v25 = vld [vmem:[%s2547_s11 + $0x18] sm:$0xff] }
 0x2d7   :  { %1537 = vmatmul.msk.f32.vlgmr.msra.gmra.mxu0 %vm485_vm7, %v508_v26  ;;  %730 = vmatpush.msrb.mxu3 %v631_v24  ;;  %v627_v26 = vld [vmem:[%s2547_s11 + $0x20] sm:$0xff] }
 0x2d8   :  { %685 = vmatpush.msrb.mxu1 %v626_v25  ;;  %708 = vmatpush.msra.mxu2 %v627_v26  ;;  %v1558_v24 = vld [vmem:[%s2546_s10 + $0x40] sm:$0xff]  ;;  %v1559_v26 = vld [vmem:[%s2546_s10 + $0x48] sm:$0xff] }
 0x354   :  { %v529_v27 = vpop.f32.mrf.mxu0 }
 0x355   :  { %v532_v28 = vmul.f32 0.010204081, %v529_v27  ;;  %v628_v27 = vld [vmem:[%s2547_s11 + $0x28] sm:$0xff] }
 0x356   :  { %731 = vmatpush.msrb.mxu3 %v628_v27  ;;  %v1546_v27 = vld [vmem:[%s2546_s10 + $0x30] sm:$0xff] }
 0x357   :  { %v533_v29 = vmul.f32 %v532_v28, %v532_v28 }
 0x359   :  { %v535_v30 = vrot.slane %v533_v29, 7  ;;  %v624_v29 = vld [vmem:[%s2547_s11 + $0x8] sm:$0xff] }
 0x35a   :  { %709 = vmatpush.msra.mxu2 %v624_v29  ;;  %v1547_v29 = vld [vmem:[%s2546_s10 + $0x38] sm:$0x3f] }
 0x35b   :  { %v537_v31 = vsub.f32 %v532_v28, %v535_v30  ;;  %v625_v30 = vld [vmem:[%s2547_s11 + $0x10] sm:$0xff] }
 0x35c   :  { %732 = vmatpush.msrb.mxu3 %v625_v30  ;;  %v1561_v30 = vld [vmem:[%s2546_s10 + $0x58] sm:$0x3f] }
 0x35d   :  { %v538_v32 = vmax.f32 %v537_v31, 0.0 }
 0x35f   :  { %v540_v33 = vadd.f32 1e-05, %v538_v32 }
 0x361   :  { %1657 = vrsqrt.f32 %v540_v33  ;;  %vm547_vm11 = vweird.f32 %v540_v33 }
 0x367   :  { %v1658_v34 = vpop.eup %1657 }
 0x368   :  { %v542_v35 = vmul.f32 %v1658_v34, %v540_v33  ;;  %vm548_vm10 = vweird.f32 %v1658_v34 }
 0x369   :  { %vm549_vm12 = vmor %vm547_vm11, %vm548_vm10 }
 0x36a   :  { %v543_v36 = vmul.f32 %v1658_v34, %v542_v35 }
 0x36c   :  { %v544_v37 = vmul.f32 0.5, %v543_v36 }
 0x36e   :  { %v545_v38 = vsub.f32 1.5, %v544_v37 }
 0x370   :  { %v546_v39 = vmul.f32 %v1658_v34, %v545_v38 }
 0x372   :  { %v550_v40 = vsel %vm549_vm12, %v1658_v34, %v546_v39 }
 0x373   :  { %552 = vst [vmem:[#allocation1] sm:$0xff] %v550_v40 }
 0x37a   :  { %v554_v42 = vld [vmem:[#allocation1 + $0x1] ss:$9 sm:$0xff] }
 0x37b   :  { %v2004_v43 = vmul.f32 %v554_v42, %v539_v41 }
 0x37d   :  { %v558_v44 = vmul.f32 %v2004_v43, %v532_v28  ;;  %v561_v45 = vperm.slane %v2004_v43, 0  ;;  %v623_v28 = vld [vmem:[%s2547_s11] sm:$0xff] }
 0x37e   :  { %686 = vmatpush.msrb.mxu1 %v623_v28  ;;  %v1560_v28 = vld [vmem:[%s2546_s10 + $0x50] sm:$0xff] }
 0x37f   :  { %574 = vrot.lane.b32.xlu1 %v561_v45, %s1761_s20  ;;  %568 = vrot.lane.b32.xlu0 %v561_v45, %s1762_s2  ;;  %v2014_v47 = vsub.f32 %v557_v46, %v558_v44 }
 0x380   :  { %562 = vrot.lane.b32.xlu2 %v561_v45, %s1760_s0 }
 0x381   :  { %v590_v48 = vperm.slane %v2014_v47, 0 }
 0x387   :  { %577 = vrot.lane.b32.xlu0 %v561_v45, %s1763_s8  ;;  %591 = vrot.lane.b32.xlu1 %v590_v48, %s1760_s0 }
 0x388   :  { %565 = vrot.lane.b32.xlu2 %v561_v45, %s1759_s4 }
 0x38f   :  { %594 = vrot.lane.b32.xlu0 %v590_v48, %s1759_s4  ;;  %600 = vrot.lane.b32.xlu1 %v590_v48, %s1764_s9 }
 0x390   :  { %571 = vrot.lane.b32.xlu2 %v561_v45, %s1764_s9 }
 0x397   :  { %606 = vrot.lane.b32.xlu0 %v590_v48, %s1763_s8 }
 0x398   :  { %597 = vrot.lane.b32.xlu2 %v590_v48, %s1762_s2 }
 0x3a0   :  { %603 = vrot.lane.b32.xlu2 %v590_v48, %s1761_s20 }
 0x3da   :  { %v563_v4 = vpop.permute.xlu2 %562 }
 0x3db   :  { %v580_v35 = vsel %vm363_vm6, %v2004_v43, %v563_v4 }
 0x3e2   :  { %v566_v18 = vpop.permute.xlu2 %565 }
 0x3e3   :  { %v581_v37 = vsel %vm101_vm0, %v580_v35, %v566_v18  ;;  %v929_v35 = vld [vmem:[%s2548_s12 + $0x60] sm:$0xff] }
 0x3ea   :  { %v572_v33 = vpop.permute.xlu2 %571 }
 0x3f1   :  { %v575_v31 = vpop.permute.xlu1 %574  ;;  %v569_v32 = vpop.permute.xlu0 %568 }
 0x3f2   :  { %v583_v38 = vsel %vm582_vm13, %v581_v37, %v569_v32  ;;  %v598_v39 = vpop.permute.xlu2 %597  ;;  %v931_v32 = vld [vmem:[%s2548_s12 + $0x70] sm:$0xff] }
 0x3f3   :  { %v585_v40 = vsel %vm584_vm14, %v583_v38, %v572_v33  ;;  %969 = vmatpush.msra.mxu3 %v931_v32  ;;  %v927_v37 = vld [vmem:[%s2548_s12 + $0x50] sm:$0xff] }
 0x3f4   :  { %v587_v45 = vsel %vm586_vm15, %v585_v40, %v575_v31 }
 0x3f9   :  { %v578_v34 = vpop.permute.xlu0 %577  ;;  %v592_v36 = vpop.permute.xlu1 %591 }
 0x3fa   :  { %v609_v41 = vsel %vm363_vm6, %v2014_v47, %v592_v36  ;;  %v588_v46 = vsel %vm142_vm1, %v587_v45, %v578_v34  ;;  %v604_v51 = vpop.permute.xlu2 %603  ;;  %v930_v34 = vld [vmem:[%s2548_s12 + $0x68] sm:$0xff]  ;;  %v928_v36 = vld [vmem:[%s2548_s12 + $0x58] sm:$0xff] }
 0x3fb   :  { %v615_v50 = vperm.slane %v588_v46, 0  ;;  %970 = vmatpush.msra.mxu3 %v930_v34  ;;  %v921_v46 = vld [vmem:[%s2548_s12 + $0x20] sm:$0xff] }
 0x3fd   :  { %v616_v47 = vmul.f32 %v615_v50, %v1987_v2  ;;  %v617_v58 = vmul.f32 %v615_v50, %v1991_v6  ;;  %v740_v6 = vld [vmem:[%s2546_s10] sm:$0xff]  ;;  %971 = vmatpush.msra.mxu3 %v929_v35  ;;  %v919_v50 = vld [vmem:[%s2548_s12 + $0x10] sm:$0xff]  ;;  %s1769_s10 = smov 104  }
 0x3ff   :  { %972 = vmatpush.msra.mxu3 %v928_v36 }
 0x401   :  { %v595_v42 = vpop.permute.xlu0 %594  ;;  %v601_v48 = vpop.permute.xlu1 %600  ;;  %973 = vmatpush.msra.mxu3 %v927_v37 }
 0x402   :  { %v610_v44 = vsel %vm101_vm0, %v609_v41, %v595_v42  ;;  %v925_v41 = vld [vmem:[%s2548_s12 + $0x40] sm:$0xff]  ;;  %v924_v42 = vld [vmem:[%s2548_s12 + $0x38] sm:$0xff] }
 0x403   :  { %v611_v43 = vsel %vm582_vm13, %v610_v44, %v598_v39  ;;  %v926_v39 = vld [vmem:[%s2548_s12 + $0x48] sm:$0xff]  ;;  %v923_v44 = vld [vmem:[%s2548_s12 + $0x30] sm:$0xff] }
 0x404   :  { %v612_v49 = vsel %vm584_vm14, %v611_v43, %v601_v48  ;;  %974 = vmatpush.msra.mxu3 %v926_v39  ;;  %v922_v43 = vld [vmem:[%s2548_s12 + $0x28] sm:$0xff] }
 0x405   :  { %v613_v53 = vsel %vm586_vm15, %v612_v49, %v604_v51  ;;  %v920_v49 = vld [vmem:[%s2548_s12 + $0x18] sm:$0xff]  ;;  %v918_v51 = vld [vmem:[%s2548_s12 + $0x8] sm:$0xff] }
 0x406   :  { %975 = vmatpush.msra.mxu3 %v925_v41 }
 0x408   :  { %976 = vmatpush.msra.mxu3 %v924_v42 }
 0x409   :  { %v607_v52 = vpop.permute.xlu0 %606 }
 0x40a   :  { %v614_v54 = vsel %vm142_vm1, %v613_v53, %v607_v52  ;;  %977 = vmatpush.msra.mxu3 %v923_v44  ;;  %v917_v53 = vld [vmem:[%s2548_s12] sm:$0xff] }
 0x40b   :  { %v618_v55 = vperm.slane %v614_v54, 0 }
 0x40c   :  { %978 = vmatpush.msra.mxu3 %v922_v43 }
 0x40d   :  { %v619_v56 = vadd.f32 %v618_v55, %v616_v47  ;;  %v620_v59 = vadd.f32 %v618_v55, %v617_v58 }
 0x40e   :  { %979 = vmatpush.msra.mxu3 %v921_v46 }
 0x40f   :  { %v621_v57 = vmax.f32 %v619_v56, 0.0  ;;  %v622_v60 = vmax.f32 %v620_v59, 0.0 }
 0x410   :  { %980 = vmatpush.msra.mxu3 %v920_v49 }
 0x411   :  { %1538 = vmatmul.msk.f32.vlgmr.msrb.gmra.mxu1 %vm485_vm7, %v621_v57  ;;  %1540 = vmatmul.msk.f32.vlgmr.msra.gmra.mxu2 %vm485_vm7, %v621_v57 }
 0x412   :  { %1542 = vmatmul.msk.f32.vlgmr.msrb.gmra.mxu3 %vm485_vm7, %v621_v57 }
 0x413   :  { %981 = vmatpush.msra.mxu3 %v919_v50 }
 0x415   :  { %982 = vmatpush.msra.mxu3 %v918_v51 }
 0x417   :  { %983 = vmatpush.msra.mxu3 %v917_v53  ;;  %v1013_v53 = vld [vmem:[%s2550_s14] sm:$0x1] }
 0x419   :  { %1539 = vmatmul.msk.f32.gmra.mxu1 %vm485_vm7, %v622_v60  ;;  %1541 = vmatmul.msk.f32.gmra.mxu2 %vm485_vm7, %v622_v60 }
 0x41a   :  { %1543 = vmatmul.msk.f32.gmra.mxu3 %vm485_vm7, %v622_v60 }
 0x48e   :  { %v688_v2 = vpop.f32.mrf.mxu1 }
 0x494   :  { %v711_v61 = vpop.f32.mrf.mxu2 }
 0x495   :  { %v1632_v62 = vpack.i.bf16 %v711_v61, %v688_v2  ;;  %v734_v0 = vpop.f32.mrf.mxu3 }
 0x496   :  { %v691_v63 = vpop.f32.mrf.mxu1  ;;  %v1637_v3 = vpack.i.bf16 %v734_v0, %v711_v61 }
 0x497   :  { %1633 = vrot.lane.b32.xlu0 %v1632_v62, %s1755_s22  ;;  %757 = vrot.lane.b32.xlu1 %v691_v63, %s1755_s22 }
 0x498   :  { %1553 = vmatpush.msk.msra.mxu1 %vm372_vm4, %v691_v63 }
 0x49a   :  { %838 = vmatpush.msra.mxu1 %v688_v2 }
 0x49b   :  { %1554 = vmatmul.msk.f32.vlgmr.msra.gmra.mxu1 %vm765_vm2, %v740_v6 }
 0x49c   :  { %v714_v1 = vpop.f32.mrf.mxu2 }
 0x49d   :  { %759 = vrot.lane.b32.xlu2 %v714_v1, %s1755_s22  ;;  %v737_v4 = vpop.f32.mrf.mxu3 }
 0x49f   :  { %1638 = vrot.lane.b32.xlu0 %v1637_v3, %s1760_s0  ;;  %863 = vrot.lane.b32.xlu1 %v714_v1, %s1760_s0 }
 0x4a3   :  { %1555 = vmatmul.msk.f32.gmra.mxu1 %vm765_vm2, %v741_v5 }
 0x4a5   :  { %865 = vrot.lane.b32.xlu2 %v737_v4, %s1760_s0 }
 0x4ab   :  { %1556 = vmatmul.msk.f32.gmra.mxu1 %vm765_vm2, %v742_v7 }
 0x4b3   :  { %1557 = vmatmul.msk.f32.gmra.mxu1 %vm765_vm2, %v743_v8 }
 0x4f7   :  { %v760_v9 = vpop.permute.xlu2 %759 }
 0x4ff   :  { %v866_v17 = vpop.permute.xlu2 %865 }
 0x509   :  { %v1634_v10 = vpop.permute.xlu0 %1633  ;;  %v758_v11 = vpop.permute.xlu1 %757 }
 0x50a   :  { %v1636_v12 = vunpack.i.h.bf16 %v1634_v10  ;;  %v1635_v13 = vunpack.i.l.bf16 %v1634_v10  ;;  %v763_v14 = vsel %vm761_vm3, %v758_v11, %v760_v9 }
 0x50b   :  { %1548 = vmatpush.msk.msrb.mxu0 %vm372_vm4, %v763_v14 }
 0x50c   :  { %v762_v16 = vsel %vm761_vm3, %v1635_v13, %v1636_v12 }
 0x50d   :  { %795 = vmatpush.msrb.mxu0 %v762_v16 }
 0x50e   :  { %1549 = vmatmul.msk.f32.vlgmr.msrb.gmra.mxu0 %vm765_vm2, %v1544_v15 }
 0x511   :  { %v1639_v18 = vpop.permute.xlu0 %1638  ;;  %v864_v19 = vpop.permute.xlu1 %863 }
 0x512   :  { %v1641_v20 = vunpack.i.h.bf16 %v1639_v18  ;;  %v1640_v21 = vunpack.i.l.bf16 %v1639_v18  ;;  %v868_v22 = vsel %vm363_vm6, %v864_v19, %v866_v17 }
 0x513   :  { %1562 = vmatpush.msk.msrb.mxu1 %vm372_vm4, %v868_v22  ;;  %1610 = vmatpush.msk.msrb.mxu2 %vm372_vm4, %v868_v22 }
 0x514   :  { %v867_v25 = vsel %vm363_vm6, %v1640_v21, %v1641_v20 }
 0x515   :  { %899 = vmatpush.msrb.mxu1 %v867_v25  ;;  %1611 = vmatpush.msrb.mxu2 %v867_v25 }
 0x516   :  { %1550 = vmatmul.msk.f32.gmra.mxu0 %vm765_vm2, %v1545_v23  ;;  %1563 = vmatmul.msk.f32.vlgmr.msrb.gmra.mxu1 %vm765_vm2, %v1558_v24 }
 0x517   :  { %1564 = vmatmul.msk.f32.vlgmr.msrb.gmra.mxu2 %vm765_vm2, %v1559_v26 }
 0x518   :  { %v840_v31 = vpop.f32.mrf.mxu1 }
 0x51e   :  { %1551 = vmatmul.msk.f32.gmra.mxu0 %vm765_vm2, %v1546_v27 }
 0x51f   :  { %1565 = vmatmul.msk.f32.gmra.mxu2 %vm765_vm2, %v1560_v28 }
 0x520   :  { %v843_v33 = vpop.f32.mrf.mxu1 }
 0x526   :  { %1552 = vmatmul.msk.f32.gmra.mxu0 %vm765_vm2, %v1547_v29 }
 0x527   :  { %1566 = vmatmul.msk.f32.gmra.mxu2 %vm765_vm2, %v1561_v30  ;;  %vm1065_vm2 = vcmask 326656  }
 0x528   :  { %v846_v40 = vpop.f32.mrf.mxu1 }
 0x530   :  { %v849_v48 = vpop.f32.mrf.mxu1 }
 0x58b   :  { %v797_v38 = vpop.f32.mrf.mxu0 }
 0x58c   :  { %v841_v56 = vadd.f32 %v840_v31, %v797_v38 }
 0x593   :  { %v800_v45 = vpop.f32.mrf.mxu0  ;;  %v901_v55 = vpop.f32.mrf.mxu1 }
 0x594   :  { %v844_v47 = vadd.f32 %v843_v33, %v800_v45  ;;  %v2283_v60 = vadd.f32 %v901_v55, %v841_v56 }
 0x596   :  { %v947_v63 = vmul.f32 %v2283_v60, %v2283_v60  ;;  %v933_v1 = vsel %vm932_vm5, %v2283_v60, 0.0 }
 0x598   :  { %v951_v9 = vsel %vm932_vm5, %v947_v63, 0.0 }
 0x59a   :  { %v904_v52 = vpop.f32.mrf.mxu2 }
 0x59b   :  { %v803_v54 = vpop.f32.mrf.mxu0  ;;  %v2281_v57 = vadd.f32 %v904_v52, %v844_v47 }
 0x59c   :  { %v847_v58 = vadd.f32 %v846_v40, %v803_v54 }
 0x59d   :  { %v948_v61 = vmul.f32 %v2281_v57, %v2281_v57  ;;  %v934_v6 = vsel %vm932_vm5, %v2281_v57, 0.0 }
 0x59e   :  { %v935_v7 = vadd.f32 %v934_v6, %v933_v1 }
 0x59f   :  { %v952_v3 = vsel %vm932_vm5, %v948_v61, 0.0 }
 0x5a0   :  { %v953_v12 = vadd.f32 %v952_v3, %v951_v9  ;;  %v1166_v3 = vld [vmem:[%s2552_s16 + $0x70] sm:$0xff]  ;;  %v1163_v9 = vld [vmem:[%s2552_s16 + $0x58] sm:$0xff] }
 0x5a1   :  { %1180 = vmatpush.msra.mxu0 %v1166_v3 }
 0x5a2   :  { %v907_v59 = vpop.f32.mrf.mxu2 }
 0x5a3   :  { %v2285_v2 = vadd.f32 %v907_v59, %v847_v58  ;;  %v806_v62 = vpop.f32.mrf.mxu0 }
 0x5a4   :  { %v850_v5 = vadd.f32 %v849_v48, %v806_v62  ;;  %v995_v48 = vld [vmem:[%s2549_s13] sm:$0x1]  ;;  %s1767_s13 = smov 56  }
 0x5a5   :  { %v949_v0 = vmul.f32 %v2285_v2, %v2285_v2  ;;  %v936_v4 = vsel %vm932_vm5, %v2285_v2, 0.0 }
 0x5a6   :  { %v937_v13 = vadd.f32 %v936_v4, %v935_v7  ;;  %v1165_v4 = vld [vmem:[%s2552_s16 + $0x68] sm:$0xff] }
 0x5a7   :  { %v954_v10 = vsel %vm932_vm5, %v949_v0, 0.0  ;;  %1181 = vmatpush.msra.mxu0 %v1165_v4 }
 0x5a8   :  { %v955_v16 = vadd.f32 %v954_v10, %v953_v12  ;;  %v1162_v10 = vld [vmem:[%s2552_s16 + $0x50] sm:$0xff]  ;;  %v1161_v12 = vld [vmem:[%s2552_s16 + $0x48] sm:$0xff] }
 0x5aa   :  { %v910_v8 = vpop.f32.mrf.mxu2 }
 0x5ab   :  { %v2302_v11 = vadd.f32 %v910_v8, %v850_v5  ;;  %v1164_v5 = vld [vmem:[%s2552_s16 + $0x60] sm:$0xff] }
 0x5ac   :  { %1182 = vmatpush.msra.mxu0 %v1164_v5 }
 0x5ad   :  { %v939_v14 = vsel %vm938_vm8, %v2302_v11, 0.0  ;;  %v950_v15 = vmul.f32 %v2302_v11, %v2302_v11 }
 0x5ae   :  { %v940_v17 = vadd.f32 %v939_v14, %v937_v13  ;;  %1183 = vmatpush.msra.mxu0 %v1163_v9  ;;  %v1160_v14 = vld [vmem:[%s2552_s16 + $0x40] sm:$0xff] }
 0x5af   :  { %v956_v18 = vsel %vm938_vm8, %v950_v15, 0.0  ;;  %vm1071_vm8 = vcmask 588800  }
 0x5b0   :  { %v941_v19 = vrot.slane %v940_v17, 4  ;;  %v957_v20 = vadd.f32 %v956_v18, %v955_v16  ;;  %1184 = vmatpush.msra.mxu0 %v1162_v10  ;;  %v1158_v18 = vld [vmem:[%s2552_s16 + $0x30] sm:$0xff] }
 0x5b2   :  { %v942_v21 = vadd.f32 %v941_v19, %v940_v17  ;;  %v958_v22 = vrot.slane %v957_v20, 4  ;;  %1185 = vmatpush.msra.mxu0 %v1161_v12  ;;  %v1159_v17 = vld [vmem:[%s2552_s16 + $0x38] sm:$0xff]  ;;  %v1157_v19 = vld [vmem:[%s2552_s16 + $0x28] sm:$0xff] }
 0x5b4   :  { %v943_v23 = vrot.slane %v942_v21, 2  ;;  %v959_v24 = vadd.f32 %v958_v22, %v957_v20  ;;  %1186 = vmatpush.msra.mxu0 %v1160_v14 }
 0x5b6   :  { %v944_v25 = vadd.f32 %v943_v23, %v942_v21  ;;  %v960_v26 = vrot.slane %v959_v24, 2  ;;  %1187 = vmatpush.msra.mxu0 %v1159_v17  ;;  %v1156_v21 = vld [vmem:[%s2552_s16 + $0x20] sm:$0xff] }
 0x5b8   :  { %v945_v27 = vrot.slane %v944_v25, 1  ;;  %v961_v28 = vadd.f32 %v960_v26, %v959_v24  ;;  %1188 = vmatpush.msra.mxu0 %v1158_v18 }
 0x5ba   :  { %v962_v29 = vrot.slane %v961_v28, 1  ;;  %v946_v30 = vadd.f32 %v945_v27, %v944_v25  ;;  %1189 = vmatpush.msra.mxu0 %v1157_v19  ;;  %v1155_v25 = vld [vmem:[%s2552_s16 + $0x18] sm:$0xff] }
 0x5bc   :  { %v963_v31 = vadd.f32 %v962_v29, %v961_v28  ;;  %1190 = vmatpush.msra.mxu0 %v1156_v21  ;;  %v1154_v28 = vld [vmem:[%s2552_s16 + $0x10] sm:$0xff] }
 0x5be   :  { %v964_v32 = vsel %vm507_vm9, %v946_v30, %v963_v31  ;;  %vm1062_vm9 = vcmask 195584   ;;  %1191 = vmatpush.msra.mxu0 %v1155_v25  ;;  %v1153_v30 = vld [vmem:[%s2552_s16 + $0x8] sm:$0xff]  ;;  %v1210_v25 = vld [vmem:[%s2551_s15 + $0x10] sm:$0xff] }
 0x5bf   :  { %1567 = vmatmul.msk.f32.vlgmr.msra.gmra.mxu3 %vm932_vm5, %v964_v32 }
 0x5c0   :  { %1192 = vmatpush.msra.mxu0 %v1154_v28 }
 0x5c2   :  { %1193 = vmatpush.msra.mxu0 %v1153_v30 }
 0x642   :  { %v985_v33 = vpop.f32.mrf.mxu3 }
 0x643   :  { %v988_v34 = vmul.f32 0.0022222223, %v985_v33  ;;  %v1152_v33 = vld [vmem:[%s2552_s16] sm:$0xff]  ;;  %s1771_s16 = smov 100  }
 0x644   :  { %1194 = vmatpush.msra.mxu0 %v1152_v33  ;;  %v1211_v33 = vld [vmem:[%s2551_s15 + $0x18] sm:$0xff] }
 0x645   :  { %v989_v35 = vmul.f32 %v988_v34, %v988_v34 }
 0x647   :  { %v991_v36 = vrot.slane %v989_v35, 7 }
 0x649   :  { %v993_v37 = vsub.f32 %v988_v34, %v991_v36 }
 0x64b   :  { %v994_v38 = vmax.f32 %v993_v37, 0.0 }
 0x64d   :  { %v996_v39 = vadd.f32 1e-05, %v994_v38 }
 0x64f   :  { %1659 = vrsqrt.f32 %v996_v39  ;;  %vm1003_vm11 = vweird.f32 %v996_v39 }
 0x655   :  { %v1660_v40 = vpop.eup %1659 }
 0x656   :  { %v998_v41 = vmul.f32 %v1660_v40, %v996_v39  ;;  %vm1004_vm10 = vweird.f32 %v1660_v40 }
 0x657   :  { %vm1005_vm12 = vmor %vm1003_vm11, %vm1004_vm10 }
 0x658   :  { %v999_v42 = vmul.f32 %v1660_v40, %v998_v41 }
 0x65a   :  { %v1000_v44 = vmul.f32 0.5, %v999_v42 }
 0x65c   :  { %v1001_v45 = vsub.f32 1.5, %v1000_v44 }
 0x65e   :  { %v1002_v43 = vmul.f32 %v1660_v40, %v1001_v45 }
 0x660   :  { %v1006_v46 = vsel %vm1005_vm12, %v1660_v40, %v1002_v43 }
 0x661   :  { %1008 = vst [vmem:[#allocation1] sm:$0xff] %v1006_v46 }
 0x668   :  { %v1010_v49 = vld [vmem:[#allocation1 + $0x1] ss:$9 sm:$0xff] }
 0x669   :  { %v2312_v50 = vmul.f32 %v1010_v49, %v995_v48 }
 0x66b   :  { %v1017_v51 = vperm.slane %v2312_v50, 0  ;;  %v1014_v52 = vmul.f32 %v2312_v50, %v988_v34 }
 0x66d   :  { %1024 = vrot.lane.b32.xlu0 %v1017_v51, %s1758_s3  ;;  %1021 = vrot.lane.b32.xlu2 %v1017_v51, %s1760_s0  ;;  %v2328_v54 = vsub.f32 %v1013_v53, %v1014_v52 }
 0x66e   :  { %1018 = vrot.lane.b32.xlu1 %v1017_v51, %s1755_s22 }
 0x66f   :  { %v1081_v47 = vperm.slane %v2328_v54, 0 }
 0x675   :  { %1033 = vrot.lane.b32.xlu0 %v1017_v51, %s1762_s2  ;;  %1027 = vrot.lane.b32.xlu2 %v1017_v51, %s1759_s4 }
 0x676   :  { %1030 = vrot.lane.b32.xlu1 %v1017_v51, %s1765_s5 }
 0x67d   :  { %1042 = vrot.lane.b32.xlu0 %v1017_v51, %s1766_s6  ;;  %1036 = vrot.lane.b32.xlu2 %v1017_v51, %s1767_s13 }
 0x67e   :  { %1039 = vrot.lane.b32.xlu1 %v1017_v51, %s1764_s9 }
 0x685   :  { %1051 = vrot.lane.b32.xlu0 %v1017_v51, %s1763_s8  ;;  %1045 = vrot.lane.b32.xlu2 %v1017_v51, %s1761_s20 }
 0x686   :  { %1048 = vrot.lane.b32.xlu1 %v1017_v51, %s1768_s27 }
 0x68d   :  { %1054 = vrot.lane.b32.xlu2 %v1017_v51, %s1769_s10  ;;  %1085 = vrot.lane.b32.xlu0 %v1081_v47, %s1760_s0 }
 0x68e   :  { %1057 = vrot.lane.b32.xlu1 %v1017_v51, %s1770_s28 }
 0x695   :  { %1088 = vrot.lane.b32.xlu2 %v1081_v47, %s1758_s3  ;;  %1094 = vrot.lane.b32.xlu0 %v1081_v47, %s1765_s5  ;;  %s1501_s3 = sshll.u32 %s2554_s18, 4  ;;  %s1502_s3 = int_to_ptr.hbm [resolvable:$true] %s1501_s3 }
 0x696   :  { %1082 = vrot.lane.b32.xlu1 %v1081_v47, %s1755_s22 }
 0x69d   :  { %1097 = vrot.lane.b32.xlu2 %v1081_v47, %s1762_s2  ;;  %1103 = vrot.lane.b32.xlu0 %v1081_v47, %s1764_s9 }
 0x69e   :  { %1091 = vrot.lane.b32.xlu1 %v1081_v47, %s1759_s4 }
 0x6a5   :  { %1106 = vrot.lane.b32.xlu2 %v1081_v47, %s1766_s6  ;;  %1112 = vrot.lane.b32.xlu0 %v1081_v47, %s1768_s27 }
 0x6a6   :  { %1100 = vrot.lane.b32.xlu1 %v1081_v47, %s1767_s13 }
 0x6ad   :  { %1115 = vrot.lane.b32.xlu2 %v1081_v47, %s1763_s8  ;;  %1118 = vrot.lane.b32.xlu0 %v1081_v47, %s1769_s10 }
 0x6ae   :  { %1109 = vrot.lane.b32.xlu1 %v1081_v47, %s1761_s20 }
 0x6b6   :  { %1121 = vrot.lane.b32.xlu1 %v1081_v47, %s1770_s28 }
 0x6c7   :  { %v1022_v55 = vpop.permute.xlu2 %1021 }
 0x6cf   :  { %v1028_v56 = vpop.permute.xlu2 %1027 }
 0x6d7   :  { %v1037_v62 = vpop.permute.xlu2 %1036 }
 0x6df   :  { %v1025_v58 = vpop.permute.xlu0 %1024  ;;  %v2340_v1 = vpop.permute.xlu2 %1045 }
 0x6e0   :  { %v1019_v59 = vpop.permute.xlu1 %1018 }
 0x6e1   :  { %v1060_v20 = vsel %vm761_vm3, %v2312_v50, %v1019_v59 }
 0x6e2   :  { %v1061_v23 = vsel %vm363_vm6, %v1060_v20, %v1022_v55 }
 0x6e3   :  { %v1063_v27 = vsel %vm1062_vm9, %v1061_v23, %v1025_v58  ;;  %v1209_v23 = vld [vmem:[%s2551_s15 + $0x8] sm:$0xff] }
 0x6e4   :  { %v1064_v31 = vsel %vm101_vm0, %v1063_v27, %v1028_v56 }
 0x6e7   :  { %v1034_v61 = vpop.permute.xlu0 %1033  ;;  %v1055_v13 = vpop.permute.xlu2 %1054 }
 0x6e8   :  { %v1031_v63 = vpop.permute.xlu1 %1030 }
 0x6e9   :  { %v1066_v32 = vsel %vm1065_vm2, %v1064_v31, %v1031_v63  ;;  %v1572_v31 = vld [vmem:[%s2551_s15 + $0x38] sm:$0xff] }
 0x6ea   :  { %v1067_v37 = vsel %vm582_vm13, %v1066_v32, %v1034_v61 }
 0x6ef   :  { %v1043_v6 = vpop.permute.xlu0 %1042  ;;  %v1089_v22 = vpop.permute.xlu2 %1088 }
 0x6f0   :  { %v1040_v0 = vpop.permute.xlu1 %1039 }
 0x6f7   :  { %v2351_v7 = vpop.permute.xlu0 %1051  ;;  %v1098_v35 = vpop.permute.xlu2 %1097 }
 0x6f8   :  { %v1049_v8 = vpop.permute.xlu1 %1048 }
 0x6ff   :  { %v1086_v15 = vpop.permute.xlu0 %1085  ;;  %v1107_v48 = vpop.permute.xlu2 %1106 }
 0x700   :  { %v1058_v16 = vpop.permute.xlu1 %1057 }
 0x707   :  { %v1095_v26 = vpop.permute.xlu0 %1094 }
 0x708   :  { %v1083_v24 = vpop.permute.xlu1 %1082 }
 0x709   :  { %v1124_v29 = vsel %vm761_vm3, %v2328_v54, %v1083_v24  ;;  %vm1068_vm3 = vcmask 457728  }
 0x70a   :  { %v1125_v34 = vsel %vm363_vm6, %v1124_v29, %v1086_v15  ;;  %v1069_v41 = vsel %vm1068_vm3, %v1067_v37, %v1037_v62  ;;  %vm1074_vm6 = vcmask 719872   ;;  %v1116_v62 = vpop.permute.xlu2 %1115  ;;  %v1573_v37 = vld [vmem:[%s2551_s15 + $0x40] sm:$0xff] }
 0x70b   :  { %v1126_v38 = vsel %vm1062_vm9, %v1125_v34, %v1089_v22  ;;  %v1070_v42 = vsel %vm584_vm14, %v1069_v41, %v1040_v0  ;;  %v1213_v41 = vld [vmem:[%s2551_s15 + $0x28] sm:$0xff] }
 0x70c   :  { %v1072_v45 = vsel %vm1071_vm8, %v1070_v42, %v1043_v6  ;;  %v1597_v42 = vld [vmem:[%s2551_s15 + $0x80] sm:$0xff] }
 0x70d   :  { %v1073_v50 = vsel %vm586_vm15, %v1072_v45, %v2340_v1  ;;  %v1214_v45 = vld [vmem:[%s2551_s15 + $0x30] sm:$0xff] }
 0x70e   :  { %v1075_v51 = vsel %vm1074_vm6, %v1073_v50, %v1049_v8  ;;  %v1600_v50 = vld [vmem:[%s2551_s15 + $0x98] sm:$0xff] }
 0x70f   :  { %v1104_v39 = vpop.permute.xlu0 %1103  ;;  %v1076_v54 = vsel %vm142_vm1, %v1075_v51, %v2351_v7  ;;  %v1578_v51 = vld [vmem:[%s2551_s15 + $0x68] sm:$0xff] }
 0x710   :  { %v1092_v36 = vpop.permute.xlu1 %1091 }
 0x711   :  { %v1127_v40 = vsel %vm101_vm0, %v1126_v38, %v1092_v36  ;;  %vm1077_vm0 = vcmask 850944   ;;  %v1212_v38 = vld [vmem:[%s2551_s15 + $0x20] sm:$0xff] }
 0x712   :  { %v1128_v44 = vsel %vm1065_vm2, %v1127_v40, %v1095_v26  ;;  %v1078_v58 = vsel %vm1077_vm0, %v1076_v54, %v1055_v13  ;;  %v1574_v40 = vld [vmem:[%s2551_s15 + $0x48] sm:$0xff] }
 0x713   :  { %v1129_v46 = vsel %vm582_vm13, %v1128_v44, %v1098_v35  ;;  %v1079_v61 = vsel %vm485_vm7, %v1078_v58, %v1058_v16  ;;  %v1595_v35 = vld [vmem:[%s2551_s15 + $0x70] sm:$0xff] }
 0x714   :  { %v1138_v6 = vperm.slane %v1079_v61, 0  ;;  %v1575_v44 = vld [vmem:[%s2551_s15 + $0x50] sm:$0xff] }
 0x716   :  { %v1139_v5 = vmul.f32 %v1138_v6, %v2283_v60  ;;  %v1140_v10 = vmul.f32 %v1138_v6, %v2281_v57  ;;  %v1141_v14 = vmul.f32 %v1138_v6, %v2285_v2  ;;  %v1142_v17 = vmul.f32 %v1138_v6, %v2302_v11  ;;  %v1208_v11 = vld [vmem:[%s2551_s15] sm:$0xff] }
 0x717   :  { %v1113_v52 = vpop.permute.xlu0 %1112 }
 0x718   :  { %v1101_v43 = vpop.permute.xlu1 %1100 }
 0x719   :  { %v1130_v49 = vsel %vm1068_vm3, %v1129_v46, %v1101_v43  ;;  %v1598_v43 = vld [vmem:[%s2551_s15 + $0x88] sm:$0xff]  ;;  %v1576_v46 = vld [vmem:[%s2551_s15 + $0x58] sm:$0xff] }
 0x71a   :  { %v1131_v53 = vsel %vm584_vm14, %v1130_v49, %v1104_v39  ;;  %v1596_v39 = vld [vmem:[%s2551_s15 + $0x78] sm:$0xff]  ;;  %v1577_v49 = vld [vmem:[%s2551_s15 + $0x60] sm:$0xff] }
 0x71b   :  { %v1132_v47 = vsel %vm1071_vm8, %v1131_v53, %v1107_v48  ;;  %v1599_v48 = vld [vmem:[%s2551_s15 + $0x90] sm:$0xff] }
 0x71f   :  { %v1119_v0 = vpop.permute.xlu0 %1118 }
 0x720   :  { %v1110_v55 = vpop.permute.xlu1 %1109 }
 0x721   :  { %v1133_v56 = vsel %vm586_vm15, %v1132_v47, %v1110_v55 }
 0x722   :  { %v1134_v59 = vsel %vm1074_vm6, %v1133_v56, %v1113_v52  ;;  %v1601_v52 = vld [vmem:[%s2551_s15 + $0xa0] sm:$0xff]  ;;  %s1772_s15 = smov [#allocation7]  }
 0x723   :  { %v1135_v63 = vsel %vm142_vm1, %v1134_v59, %v1116_v62  ;;  %vm1238_vm1 = vcmask 244736   ;;  %v2514_v56 = vld [vmem:[%s2553_s17] ss:$0 sm:$0xff]  ;;  %s1499_s17 = sshll.u32 %s1772_s15, 4  ;;  %s1500_s17 = int_to_ptr.vmem [resolvable:$true] %s1499_s17 }
 0x724   :  { %v1136_v1 = vsel %vm1077_vm0, %v1135_v63, %v1119_v0 }
 0x728   :  { %v1122_v3 = vpop.permute.xlu1 %1121 }
 0x729   :  { %v1137_v4 = vsel %vm485_vm7, %v1136_v1, %v1122_v3 }
 0x72a   :  { %v1143_v7 = vperm.slane %v1137_v4, 0 }
 0x72c   :  { %v1144_v8 = vadd.f32 %v1143_v7, %v1139_v5  ;;  %v1145_v12 = vadd.f32 %v1143_v7, %v1140_v10  ;;  %v1146_v15 = vadd.f32 %v1143_v7, %v1141_v14  ;;  %v1147_v60 = vadd.f32 %v1143_v7, %v1142_v17 }
 0x72e   :  { %v1148_v9 = vmax.f32 %v1144_v8, 0.0  ;;  %v1149_v13 = vmax.f32 %v1145_v12, 0.0  ;;  %v1150_v16 = vmax.f32 %v1146_v15, 0.0  ;;  %v1151_v18 = vmax.f32 %v1147_v60, 0.0 }
 0x730   :  { %1568 = vmatmul.msk.f32.vlgmr.msra.gmra.mxu0 %vm932_vm5, %v1148_v9 }
 0x738   :  { %1569 = vmatmul.msk.f32.gmra.mxu0 %vm932_vm5, %v1149_v13 }
 0x740   :  { %1570 = vmatmul.msk.f32.gmra.mxu0 %vm932_vm5, %v1150_v16 }
 0x748   :  { %1571 = vmatmul.msk.f32.gmra.mxu0 %vm932_vm5, %v1151_v18 }
 0x7ad   :  { %v1196_v19 = vpop.f32.mrf.mxu0 }
 0x7b5   :  { %v1199_v20 = vpop.f32.mrf.mxu0 }
 0x7bd   :  { %v1202_v21 = vpop.f32.mrf.mxu0 }
 0x7be   :  { %v1642_v57 = vpack.i.bf16 %v1199_v20, %v1202_v21 }
 0x7c0   :  { %1643 = vrot.lane.b32.xlu0 %v1642_v57, %s1771_s16 }
 0x7c5   :  { %v1205_v22 = vpop.f32.mrf.mxu0 }
 0x7c6   :  { %1375 = vrot.lane.b32.xlu1 %v1205_v22, %s1766_s6  ;;  %1233 = vrot.lane.b32.xlu2 %v1205_v22, %s1771_s16 }
 0x7c7   :  { %1587 = vmatpush.msk.msra.mxu1 %vm372_vm4, %v1205_v22 }
 0x7c8   :  { %1227 = vrot.lane.b32.xlu0 %v1196_v19, %s1771_s16 }
 0x7c9   :  { %1336 = vmatpush.msra.mxu1 %v1202_v21 }
 0x7cb   :  { %1337 = vmatpush.msra.mxu1 %v1199_v20 }
 0x7cd   :  { %1338 = vmatpush.msra.mxu1 %v1196_v19 }
 0x7ce   :  { %1369 = vrot.lane.b32.xlu1 %v1196_v19, %s1766_s6  ;;  %1648 = vrot.lane.b32.xlu2 %v1642_v57, %s1766_s6 }
 0x7cf   :  { %1588 = vmatmul.msk.f32.vlgmr.msra.gmra.mxu1 %vm1238_vm1, %v1208_v11 }
 0x7d7   :  { %1589 = vmatmul.msk.f32.gmra.mxu1 %vm1238_vm1, %v1209_v23 }
 0x7df   :  { %1590 = vmatmul.msk.f32.gmra.mxu1 %vm1238_vm1, %v1210_v25 }
 0x7e7   :  { %1591 = vmatmul.msk.f32.gmra.mxu1 %vm1238_vm1, %v1211_v33 }
 0x7ef   :  { %1592 = vmatmul.msk.f32.gmra.mxu1 %vm1238_vm1, %v1212_v38 }
 0x7f7   :  { %1593 = vmatmul.msk.f32.gmra.mxu1 %vm1238_vm1, %v1213_v41 }
 0x7ff   :  { %1594 = vmatmul.msk.f32.gmra.mxu1 %vm1238_vm1, %v1214_v45 }
 0x820   :  { %v1234_v2 = vpop.permute.xlu2 %1233 }
 0x821   :  { %1579 = vmatpush.msk.msrb.mxu3 %vm372_vm4, %v1234_v2 }
 0x828   :  { %v1649_v28 = vpop.permute.xlu2 %1648 }
 0x829   :  { %v1650_v30 = vunpack.i.l.bf16 %v1649_v28  ;;  %v1651_v34 = vunpack.i.h.bf16 %v1649_v28 }
 0x832   :  { %v1644_v24 = vpop.permute.xlu0 %1643 }
 0x833   :  { %v1645_v26 = vunpack.i.l.bf16 %v1644_v24  ;;  %v1646_v27 = vunpack.i.h.bf16 %v1644_v24 }
 0x835   :  { %1275 = vmatpush.msrb.mxu3 %v1645_v26 }
 0x837   :  { %1276 = vmatpush.msrb.mxu3 %v1646_v27 }
 0x838   :  { %v1376_v29 = vpop.permute.xlu1 %1375 }
 0x839   :  { %1602 = vmatpush.msk.msra.mxu2 %vm372_vm4, %v1376_v29  ;;  %vm1487_vm4 = vcmask 228352  }
 0x83a   :  { %v1228_v32 = vpop.permute.xlu0 %1227 }
 0x83b   :  { %1277 = vmatpush.msrb.mxu3 %v1228_v32  ;;  %1416 = vmatpush.msra.mxu2 %v1650_v30 }
 0x83c   :  { %1580 = vmatmul.msk.f32.vlgmr.msrb.gmra.mxu3 %vm1238_vm1, %v1572_v31 }
 0x83d   :  { %1417 = vmatpush.msra.mxu2 %v1651_v34 }
 0x840   :  { %v1370_v36 = vpop.permute.xlu1 %1369 }
 0x841   :  { %1418 = vmatpush.msra.mxu2 %v1370_v36 }
 0x842   :  { %1603 = vmatmul.msk.f32.vlgmr.msra.gmra.mxu2 %vm1238_vm1, %v1595_v35 }
 0x844   :  { %1581 = vmatmul.msk.f32.gmra.mxu3 %vm1238_vm1, %v1573_v37 }
 0x84a   :  { %1604 = vmatmul.msk.f32.gmra.mxu2 %vm1238_vm1, %v1596_v39 }
 0x84c   :  { %1582 = vmatmul.msk.f32.gmra.mxu3 %vm1238_vm1, %v1574_v40  ;;  %v1340_v53 = vpop.f32.mrf.mxu1 }
 0x852   :  { %1605 = vmatmul.msk.f32.gmra.mxu2 %vm1238_vm1, %v1597_v42 }
 0x854   :  { %1583 = vmatmul.msk.f32.gmra.mxu3 %vm1238_vm1, %v1575_v44  ;;  %v1343_v54 = vpop.f32.mrf.mxu1 }
 0x85a   :  { %1606 = vmatmul.msk.f32.gmra.mxu2 %vm1238_vm1, %v1598_v43 }
 0x85c   :  { %1584 = vmatmul.msk.f32.gmra.mxu3 %vm1238_vm1, %v1576_v46  ;;  %v1346_v62 = vpop.f32.mrf.mxu1 }
 0x862   :  { %1607 = vmatmul.msk.f32.gmra.mxu2 %vm1238_vm1, %v1599_v48 }
 0x864   :  { %1585 = vmatmul.msk.f32.gmra.mxu3 %vm1238_vm1, %v1577_v49  ;;  %v1349_v7 = vpop.f32.mrf.mxu1 }
 0x86a   :  { %1608 = vmatmul.msk.f32.gmra.mxu2 %vm1238_vm1, %v1600_v50 }
 0x86c   :  { %1586 = vmatmul.msk.f32.gmra.mxu3 %vm1238_vm1, %v1578_v51  ;;  %v1352_v21 = vpop.f32.mrf.mxu1 }
 0x872   :  { %1609 = vmatmul.msk.f32.gmra.mxu2 %vm1238_vm1, %v1601_v52 }
 0x874   :  { %v1355_v30 = vpop.f32.mrf.mxu1 }
 0x87c   :  { %v1358_v42 = vpop.f32.mrf.mxu1 }
 0x8bf   :  { %v1279_v47 = vpop.f32.mrf.mxu3 }
 0x8c0   :  { %v1341_v55 = vadd.f32 %v1340_v53, %v1279_v47 }
 0x8c5   :  { %v1420_v58 = vpop.f32.mrf.mxu2 }
 0x8c6   :  { %v1441_v59 = vadd.f32 %v1420_v58, %v1341_v55 }
 0x8c7   :  { %v1282_v61 = vpop.f32.mrf.mxu3 }
 0x8c8   :  { %v1452_v63 = vadd.f32 %v2514_v56, %v1441_v59  ;;  %v1344_v0 = vadd.f32 %v1343_v54, %v1282_v61 }
 0x8ca   :  { %v1459_v6 = vmul.f32 0.5, %v1452_v63 }
 0x8cc   :  { %1661 = vtanh.f32 %v1459_v6 }
 0x8cd   :  { %v1423_v1 = vpop.f32.mrf.mxu2 }
 0x8ce   :  { %v1442_v3 = vadd.f32 %v1423_v1, %v1344_v0 }
 0x8cf   :  { %v1285_v4 = vpop.f32.mrf.mxu3 }
 0x8d0   :  { %v1453_v5 = vadd.f32 %v2514_v56, %v1442_v3  ;;  %v1347_v10 = vadd.f32 %v1346_v62, %v1285_v4 }
 0x8d2   :  { %v1662_v8 = vpop.eup %1661  ;;  %v1460_v9 = vmul.f32 0.5, %v1453_v5 }
 0x8d3   :  { %v1473_v12 = vmul.f32 0.5, %v1662_v8 }
 0x8d4   :  { %1663 = vtanh.f32 %v1460_v9 }
 0x8d5   :  { %v1480_v13 = vadd.f32 0.5, %v1473_v12  ;;  %v1426_v14 = vpop.f32.mrf.mxu2 }
 0x8d6   :  { %v1443_v15 = vadd.f32 %v1426_v14, %v1347_v10 }
 0x8d7   :  { %1488 = vst.msk [vmem:[#allocation7] sm:$0xff] %vm1487_vm4, %v1480_v13  ;;  %v1288_v16 = vpop.f32.mrf.mxu3 }
 0x8d8   :  { %v1454_v17 = vadd.f32 %v2514_v56, %v1443_v15  ;;  %v1350_v19 = vadd.f32 %v1349_v7, %v1288_v16 }
 0x8da   :  { %v1664_v60 = vpop.eup %1663  ;;  %v1461_v18 = vmul.f32 0.5, %v1454_v17 }
 0x8db   :  { %v1474_v20 = vmul.f32 0.5, %v1664_v60 }
 0x8dc   :  { %1665 = vtanh.f32 %v1461_v18 }
 0x8dd   :  { %v1481_v57 = vadd.f32 0.5, %v1474_v20  ;;  %v1429_v22 = vpop.f32.mrf.mxu2 }
 0x8de   :  { %v1444_v2 = vadd.f32 %v1429_v22, %v1350_v19 }
 0x8df   :  { %1489 = vst.msk [vmem:[#allocation7 + $0x8] sm:$0xff] %vm1487_vm4, %v1481_v57  ;;  %v1291_v11 = vpop.f32.mrf.mxu3 }
 0x8e0   :  { %v1455_v23 = vadd.f32 %v2514_v56, %v1444_v2  ;;  %v1353_v26 = vadd.f32 %v1352_v21, %v1291_v11 }
 0x8e2   :  { %v1666_v24 = vpop.eup %1665  ;;  %v1462_v25 = vmul.f32 0.5, %v1455_v23 }
 0x8e3   :  { %v1475_v27 = vmul.f32 0.5, %v1666_v24 }
 0x8e4   :  { %1667 = vtanh.f32 %v1462_v25 }
 0x8e5   :  { %v1482_v28 = vadd.f32 0.5, %v1475_v27  ;;  %v1432_v29 = vpop.f32.mrf.mxu2 }
 0x8e6   :  { %v1445_v31 = vadd.f32 %v1432_v29, %v1353_v26 }
 0x8e7   :  { %1490 = vst.msk [vmem:[#allocation7 + $0x10] sm:$0xff] %vm1487_vm4, %v1482_v28  ;;  %v1294_v32 = vpop.f32.mrf.mxu3 }
 0x8e8   :  { %v1456_v33 = vadd.f32 %v2514_v56, %v1445_v31  ;;  %v1356_v36 = vadd.f32 %v1355_v30, %v1294_v32 }
 0x8ea   :  { %v1668_v34 = vpop.eup %1667  ;;  %v1463_v35 = vmul.f32 0.5, %v1456_v33 }
 0x8eb   :  { %v1476_v37 = vmul.f32 0.5, %v1668_v34 }
 0x8ec   :  { %1669 = vtanh.f32 %v1463_v35 }
 0x8ed   :  { %v1483_v38 = vadd.f32 0.5, %v1476_v37  ;;  %v1435_v39 = vpop.f32.mrf.mxu2 }
 0x8ee   :  { %v1446_v40 = vadd.f32 %v1435_v39, %v1356_v36 }
 0x8ef   :  { %1491 = vst.msk [vmem:[#allocation7 + $0x18] sm:$0xff] %vm1487_vm4, %v1483_v38  ;;  %v1297_v41 = vpop.f32.mrf.mxu3 }
 0x8f0   :  { %v1457_v44 = vadd.f32 %v2514_v56, %v1446_v40  ;;  %v1359_v46 = vadd.f32 %v1358_v42, %v1297_v41 }
 0x8f2   :  { %v1670_v45 = vpop.eup %1669  ;;  %v1464_v43 = vmul.f32 0.5, %v1457_v44 }
 0x8f3   :  { %v1477_v48 = vmul.f32 0.5, %v1670_v45 }
 0x8f4   :  { %1671 = vtanh.f32 %v1464_v43 }
 0x8f5   :  { %v1484_v49 = vadd.f32 0.5, %v1477_v48  ;;  %v1438_v50 = vpop.f32.mrf.mxu2 }
 0x8f6   :  { %v1447_v51 = vadd.f32 %v1438_v50, %v1359_v46 }
 0x8f7   :  { %1492 = vst.msk [vmem:[#allocation7 + $0x20] sm:$0xff] %vm1487_vm4, %v1484_v49 }
 0x8f8   :  { %v1458_v52 = vadd.f32 %v2514_v56, %v1447_v51 }
 0x8fa   :  { %v1672_v53 = vpop.eup %1671  ;;  %v1465_v54 = vmul.f32 0.5, %v1458_v52 }
 0x8fb   :  { %v1478_v47 = vmul.f32 0.5, %v1672_v53 }
 0x8fc   :  { %1673 = vtanh.f32 %v1465_v54 }
 0x8fd   :  { %v1485_v55 = vadd.f32 0.5, %v1478_v47 }
 0x8ff   :  { %1493 = vst.msk [vmem:[#allocation7 + $0x28] sm:$0xff] %vm1487_vm4, %v1485_v55 }
 0x902   :  { %v1674_v58 = vpop.eup %1673 }
 0x903   :  { %v1479_v59 = vmul.f32 0.5, %v1674_v58 }
 0x905   :  { %v1486_v61 = vadd.f32 0.5, %v1479_v59 }
 0x907   :  { %1494 = vst.msk [vmem:[#allocation7 + $0x30] sm:$0xff] %vm1487_vm4, %v1486_v61 }
 0x908   :  { %1507 = dma.vmem_to_hbm [thread:$0]  %s1500_s17, 896, %s1502_s3, [#allocation4], %s1754_s21, %s1754_s21, %s1755_s22  }
 0x909   :  { %1751 = dma.done.wait [#allocation4], 896  }
 0x90a   :  { %1752 = vsyncadd [#allocation4], 4294966400 }
 0x90b   :  { %1512 = vsyncpa [#allocation3], 1 }
 0x90c   :  { %1513 = vsyncpa [#allocation6], 1 }
 0x90d   :  { %1514 = vsyncpa [#allocation4], 1 }

</bundles_post_ra>
